<compile_context>
chip_gen: v7x
topology: tpu7x:2x2x1
jax: 0.10.0
libtpu: 0.0.40
codegen_flags: <defaults>
</compile_context>

<pallas_src>
import functools

import jax
import jax.numpy as jnp
from jax.experimental import pallas as pl
from jax.experimental.pallas import tpu as pltpu


# --------------------------- small helpers ---------------------------------

def _pad_rows(x, mult=8):
    """Pad the leading (batch / sublane) dim up to a multiple of `mult` with zeros."""
    pad = (-x.shape[0]) % mult
    if pad == 0:
        return x
    return jnp.pad(x, ((0, pad),) + ((0, 0),) * (x.ndim - 1))


def _full_spec(arr):
    """BlockSpec keeping the whole array VMEM-resident (constant block index)."""
    nd = arr.ndim
    return pl.BlockSpec(arr.shape, lambda t, _nd=nd: (0,) * _nd)


# ------------------------- GRU parameters -----------------------------------

def init_gru_params(key, in_size, hidden):
    """torch.nn.GRU-style raw parameters: W_x [in,3H], W_h [H,3H], biases [1,3H].

    Gate column order along 3H: [r | z | n], matching torch semantics
    n = tanh(gx_n + bx_n + r * (gh_n + bh_n)).
    """
    k1, k2, k3, k4 = jax.random.split(key, 4)
    s = 0.1
    return dict(
        wx=jax.random.normal(k1, (in_size, 3 * hidden), jnp.float32) * s,
        wh=jax.random.normal(k2, (hidden, 3 * hidden), jnp.float32) * s,
        bx=jax.random.normal(k3, (1, 3 * hidden), jnp.float32) * s,
        bh=jax.random.normal(k4, (1, 3 * hidden), jnp.float32) * s,
    )


def prep_gru_params(p):
    """bf16 MXU operands + f32 biases; two-matmul formulation (no fused concat)."""
    return (p['wx'].astype(jnp.bfloat16), p['wh'].astype(jnp.bfloat16),
            p['bx'], p['bh'])


# -------------------- chunked GRU sequence kernel ----------------------------

def gru_chunk_kernel(lens_ref, h0_ref, x_ref, wx_ref, wh_ref, bx_ref, bh_ref,
                     outs_ref, hfin_ref, *, tc):
    """One grid step = TC timesteps for one row-chunk of the (padded) batch.

    lens_ref : [RC, 1]      int32  (resident, one load per chunk)
    h0_ref   : [RC, H]      f32    (resident initial hidden)
    x_ref    : [TC, RC, E]  f32    (time-major chunk for this grid step)
    wx_ref   : [E, 3H]      bf16   (resident)
    wh_ref   : [H, 3H]      bf16   (resident)
    bx_ref   : [1, 3H]      f32    (resident)
    bh_ref   : [1, 3H]      f32    (resident)
    outs_ref : [TC, RC, H]  f32    (per-step hidden outputs)
    hfin_ref : [RC, H]      f32    (resident; carries the hidden state across chunks
                                    and holds the final hidden after the last chunk)
    """
    t_chunk = pl.program_id(1)

    @pl.when(t_chunk == 0)
    def _():
        hfin_ref[...] = h0_ref[...]

    lens = lens_ref[...]                  # hoisted: one [RC,1] load per chunk
    wx = wx_ref[...]
    wh = wh_ref[...]
    bx = bx_ref[...]
    bh = bh_ref[...]
    h = hfin_ref[...]
    H = h.shape[-1]
    t_base = t_chunk * tc

    # Trace-time-unrolled static chunk (TC small): full scheduler visibility,
    # static x/out indices, hidden state kept in vregs between steps.
    for i in range(tc):
        x_t = x_ref[i].astype(wx.dtype)                                 # [RC, E]
        gx = jnp.dot(x_t, wx, preferred_element_type=jnp.float32) + bx  # [RC, 3H]
        gh = jnp.dot(h.astype(wh.dtype), wh,
                     preferred_element_type=jnp.float32) + bh           # [RC, 3H]
        r = jax.nn.sigmoid(gx[:, 0:H] + gh[:, 0:H])
        z = jax.nn.sigmoid(gx[:, H:2 * H] + gh[:, H:2 * H])
        n = jnp.tanh(gx[:, 2 * H:3 * H] + r * gh[:, 2 * H:3 * H])
        h_new = (1.0 - z) * n + z * h
        h = jnp.where(t_base + i < lens, h_new, h)                      # length mask
        outs_ref[i] = h

    hfin_ref[...] = h


def run_gru(x_seq, lengths, gru_params, hidden, h0=None, *, tc=8, rc=8):
    """Length-masked GRU over a padded sequence.

    x_seq [N, L, E] f32, lengths [N] -> outputs [N, L, H], h_final [N, H].
    Whole time loop runs inside one pallas_call; grid = (row_chunks, time_chunks).
    """
    wx, wh, bx, bh = gru_params
    N, L, E = x_seq.shape
    Np = N + (-N) % rc
    Lp = L + (-L) % tc

    x_tm = jnp.transpose(x_seq, (1, 0, 2))                              # [L, N, E]
    x_tm = jnp.pad(x_tm, ((0, Lp - L), (0, Np - N), (0, 0)))
    lens = jnp.pad(lengths.astype(jnp.int32), (0, Np - N)).reshape(Np, 1)
    if h0 is None:
        h0p = jnp.zeros((Np, hidden), jnp.float32)
    else:
        h0p = jnp.pad(h0.astype(jnp.float32), ((0, Np - N), (0, 0)))

    R, Tn = Np // rc, Lp // tc

    outs_tm, hfin = pl.pallas_call(
        functools.partial(gru_chunk_kernel, tc=tc),
        grid=(R, Tn),
        in_specs=[
            pl.BlockSpec((rc, 1), lambda r, t: (r, 0)),
            pl.BlockSpec((rc, hidden), lambda r, t: (r, 0)),
            pl.BlockSpec((tc, rc, E), lambda r, t: (t, r, 0)),
            pl.BlockSpec(wx.shape, lambda r, t: (0, 0)),
            pl.BlockSpec(wh.shape, lambda r, t: (0, 0)),
            pl.BlockSpec(bx.shape, lambda r, t: (0, 0)),
            pl.BlockSpec(bh.shape, lambda r, t: (0, 0)),
        ],
        out_specs=[
            pl.BlockSpec((tc, rc, hidden), lambda r, t: (t, r, 0)),
            pl.BlockSpec((rc, hidden), lambda r, t: (r, 0)),
        ],
        out_shape=[
            jax.ShapeDtypeStruct((Lp, Np, hidden), jnp.float32),
            jax.ShapeDtypeStruct((Np, hidden), jnp.float32),
        ],
        compiler_params=pltpu.CompilerParams(
            dimension_semantics=("parallel", "arbitrary"),
            vmem_limit_bytes=64 * 1024 * 1024),
    )(lens, h0p, x_tm, wx, wh, bx, bh)

    outs = jnp.transpose(outs_tm[:L], (1, 0, 2))[:N]
    return outs, hfin[:N]


# ------------- batched attention + mixture-of-softmax head kernel ------------

def attn_mos_kernel(h_ref, sk_ref, sm_ref, kk_ref, km_ref, cx_ref,
                    wl_ref, bl_ref, wp_ref, bp_ref, et_ref, out_ref,
                    *, num_softmax, emb_size, combine_knowledge):
    """Attention + MoS output head for a chunk of TT decoder timesteps (all batch).

    h_ref  : [B, TT, Hd] f32   decoder hidden states (batch-major)
    sk_ref : [B, S, Hw]  bf16  source word keys (resident)
    sm_ref : [B, S]      f32   source word mask (resident)
    kk_ref : [B, Skg, Hk] bf16 KG word keys (resident)
    km_ref : [B, Skg]    f32   KG word mask (resident)
    cx_ref : [B, Hc]     f32   utterance-context vector (resident)
    out_ref: [B, TT, V]  f32   log-probabilities
    """
    h = h_ref[...]
    B, TT, _ = h.shape

    def attend(keys, mask):
        q = h.astype(keys.dtype)                                         # [B,TT,Hk]
        s = jnp.einsum('bth,bsh->bts', q, keys,
                       preferred_element_type=jnp.float32)               # [B,TT,S]
        m = mask[:, None, :]
        s = jnp.where(m > 0.5, s, -1e30)
        s = s - jnp.max(s, axis=-1, keepdims=True)
        p = jnp.exp(s) * m
        # approx reciprocal is fine for *internal* attention weights
        p = p * pl.reciprocal(jnp.sum(p, axis=-1, keepdims=True) + 1e-9,
                              approx=True)
        return jnp.einsum('bts,bsh->bth', p.astype(keys.dtype), keys,
                          preferred_element_type=jnp.float32)            # [B,TT,Hk]

    ctx_src = attend(sk_ref[...], sm_ref[...])
    if combine_knowledge:
        ctx_kg = attend(kk_ref[...], km_ref[...])
    else:
        ctx_kg = jnp.zeros((B, TT, kk_ref.shape[-1]), jnp.float32)

    cx = jnp.broadcast_to(cx_ref[...][:, None, :], (B, TT, cx_ref.shape[-1]))
    feat = jnp.concatenate([h, ctx_src, ctx_kg, cx], axis=-1)            # [B,TT,F]
    N = B * TT
    featf = feat.reshape(N, feat.shape[-1]).astype(wl_ref.dtype)         # [N, F]

    # mixture-of-softmax head: exact math (this is the returned output)
    latent = jnp.tanh(
        jnp.dot(featf, wl_ref[...], preferred_element_type=jnp.float32)
        + bl_ref[...])                                                   # [N, K*E]
    pr = (jnp.dot(featf, wp_ref[...], preferred_element_type=jnp.float32)
          + bp_ref[...])                                                 # [N, K]
    pr = pr - jnp.max(pr, axis=-1, keepdims=True)
    pr = jnp.exp(pr)
    prior = pr / jnp.sum(pr, axis=-1, keepdims=True)                     # exact

    K, E = num_softmax, emb_size
    lat = latent.reshape(N * K, E)                                       # (n,k) rows
    # Single (N*K, E) x (E, V) MXU matmul for all mixture components.
    lg = jnp.dot(lat.astype(et_ref.dtype), et_ref[...],
                 preferred_element_type=jnp.float32)                     # [N*K, V]
    lg3 = lg.reshape(N, K, -1)
    lg3 = lg3 - jnp.max(lg3, axis=-1, keepdims=True)
    pk = jnp.exp(lg3)
    pk = pk / jnp.sum(pk, axis=-1, keepdims=True)                        # exact
    prob = jnp.sum(prior[:, :, None] * pk, axis=1)                       # [N, V]
    out_ref[...] = jnp.log(prob + 1e-12).reshape(B, TT, -1)
    # TODO(synk): tile this head over the vocab axis (streaming softmax) at
    #             production V so emb_t / logits fit v7x's 64 MiB VMEM.


def run_attn_mos_head(h_all, src_keys, src_mask, kg_keys, kg_mask, ctx,
                      wl, bl, wp, bp, emb_t, *, num_softmax, emb_size,
                      combine_knowledge, tt=8):
    """Non-recurrent decoder head batched over all target timesteps ('parallel')."""
    Bp, Tp, Hd = h_all.shape
    V = emb_t.shape[1]
    kern = functools.partial(attn_mos_kernel, num_softmax=num_softmax,
                             emb_size=emb_size,
                             combine_knowledge=combine_knowledge)
    # TODO(synk): mark the resident operands below with pipeline_mode=pl.Buffered(1)
    #             to avoid double-buffering emb_t / wl at production sizes.
    logits = pl.pallas_call(
        kern,
        grid=(Tp // tt,),
        in_specs=[
            pl.BlockSpec((Bp, tt, Hd), lambda t: (0, t, 0)),
            _full_spec(src_keys), _full_spec(src_mask),
            _full_spec(kg_keys), _full_spec(kg_mask), _full_spec(ctx),
            _full_spec(wl), _full_spec(bl), _full_spec(wp), _full_spec(bp),
            _full_spec(emb_t),
        ],
        out_specs=pl.BlockSpec((Bp, tt, V), lambda t: (0, t, 0)),
        out_shape=jax.ShapeDtypeStruct((Bp, Tp, V), jnp.float32),
        compiler_params=pltpu.CompilerParams(
            dimension_semantics=("parallel",),
            vmem_limit_bytes=64 * 1024 * 1024),
    )(h_all, src_keys, src_mask, kg_keys, kg_mask, ctx, wl, bl, wp, bp, emb_t)
    return logits


# ------------------------------- model glue ---------------------------------

def hred_forward(params, src_sents, src_word_len, src_utterance_len,
                 KG_sents, KG_word_len, tgt_word_input, combine_knowledge, cfg):
    emb = params['emb']
    batch = src_utterance_len.shape[0]
    NS, Lw = src_sents.shape
    max_utt = NS // batch
    Hw, Hc, Hk, Hd = cfg['Hw'], cfg['Hc'], cfg['Hk'], cfg['Hd']
    E, V, K = cfg['E'], cfg['V'], cfg['K']
    Bp = batch + (-batch) % 8

    # ---- context encoder, word level: GRU over every source utterance ----
    src_emb = jnp.take(emb, src_sents, axis=0)                        # [NS, Lw, E]
    src_word_outputs, src_word_final = run_gru(
        src_emb, src_word_len, params['word'], Hw)

    # ---- context encoder, utterance level ----
    utt_feats = src_word_final.reshape(batch, max_utt, Hw)            # batch-major
    _, src_context_outputs = run_gru(
        utt_feats, src_utterance_len, params['ctx'], Hc)

    # ---- knowledge encoder (skipped entirely when knowledge is not combined) ----
    if combine_knowledge:
        kg_emb = jnp.take(emb, KG_sents, axis=0)
        KG_word_output, _ = run_gru(kg_emb, KG_word_len, params['kg'], Hk)
        kg_keys = _pad_rows(KG_word_output).astype(jnp.bfloat16)      # [Bp, Lkg, Hk]
        kg_mask = _pad_rows((jnp.arange(KG_sents.shape[1])[None, :]
                             < KG_word_len[:, None]).astype(jnp.float32))
    else:
        kg_keys = jnp.zeros((Bp, 1, Hk), jnp.bfloat16)                # tiny placeholder
        kg_mask = jnp.zeros((Bp, 1), jnp.float32)

    # ---- attention keys / masks (batch padded to a multiple of 8 sublanes) ----
    src_keys = src_word_outputs.reshape(batch, max_utt * Lw, Hw)
    src_mask = (jnp.arange(Lw)[None, :] < src_word_len[:, None]).astype(jnp.float32)
    src_mask = src_mask.reshape(batch, max_utt * Lw)
    src_keys_p = _pad_rows(src_keys).astype(jnp.bfloat16)
    src_mask_p = _pad_rows(src_mask)
    ctx_pad = _pad_rows(src_context_outputs)                          # [Bp, Hc]

    # ---- decoder: recurrence only (attention + MoS head hoisted out) ----
    h0 = jnp.tanh(src_context_outputs @ params['w_init'] + params['b_init'])
    tgt_emb = jnp.take(emb, tgt_word_input, axis=0)                   # [B, T, E]
    T = tgt_word_input.shape[1]
    dec_lens = jnp.full((batch,), T, jnp.int32)
    dec_outs, _ = run_gru(tgt_emb, dec_lens, params['dec'], Hd, h0=h0)  # [B, T, Hd]

    # ---- batched attention + mixture-of-softmax over all target steps ----
    tt = 8
    Tp = T + (-T) % tt
    h_all = jnp.pad(dec_outs, ((0, Bp - batch), (0, Tp - T), (0, 0)))  # [Bp, Tp, Hd]
    logits = run_attn_mos_head(
        h_all, src_keys_p, src_mask_p, kg_keys, kg_mask, ctx_pad,
        params['wl'], params['bl'], params['wp'], params['bp'], params['emb_t'],
        num_softmax=K, emb_size=E, combine_knowledge=combine_knowledge, tt=tt)
    return logits[:batch, :T]                                          # [B, T, V]


# ---------------------------------- main -------------------------------------

if __name__ == "__main__":
    key = jax.random.PRNGKey(0)
    # Small but (8,128)-tile friendly sizes: emb/hidden = 128 lanes, vocab = 256.
    V, E = 256, 128
    Hw = Hc = Hk = Hd = 128
    K = 2                       # dec_num_softmax
    batch, max_utt, Lw = 2, 2, 8
    Lkg, T = 8, 8
    cfg = dict(V=V, E=E, Hw=Hw, Hc=Hc, Hk=Hk, Hd=Hd, K=K)
    F = Hd + Hw + Hk + Hc

    keys = jax.random.split(key, 12)
    emb = jax.random.normal(keys[0], (V, E), jnp.float32) * 0.1

    params = dict(
        emb=emb,
        emb_t=emb.T.astype(jnp.bfloat16),                      # [E, V] for MoS head
        word=prep_gru_params(init_gru_params(keys[1], E, Hw)),
        ctx=prep_gru_params(init_gru_params(keys[2], Hw, Hc)),
        kg=prep_gru_params(init_gru_params(keys[3], E, Hk)),
        dec=prep_gru_params(init_gru_params(keys[4], E, Hd)),
        w_init=jax.random.normal(keys[5], (Hc, Hd), jnp.float32) * 0.1,
        b_init=jnp.zeros((Hd,), jnp.float32),
        wl=(jax.random.normal(keys[6], (F, K * E), jnp.float32) * 0.1
            ).astype(jnp.bfloat16),
        bl=jnp.zeros((1, K * E), jnp.float32),
        wp=(jax.random.normal(keys[7], (F, K), jnp.float32) * 0.1
            ).astype(jnp.bfloat16),
        bp=jnp.zeros((1, K), jnp.float32),
    )

    src_sents = jax.random.randint(keys[8], (batch * max_utt, Lw), 0, V,
                                   dtype=jnp.int32)
    src_word_len = jnp.array([8, 6, 7, 5], jnp.int32)
    src_utterance_len = jnp.array([2, 2], jnp.int32)
    KG_sents = jax.random.randint(keys[9], (batch, Lkg), 0, V, dtype=jnp.int32)
    KG_word_len = jnp.array([8, 6], jnp.int32)
    tgt_word_input = jax.random.randint(keys[10], (batch, T), 0, V, dtype=jnp.int32)

    logit = hred_forward(params, src_sents, src_word_len, src_utterance_len,
                         KG_sents, KG_word_len, tgt_word_input,
                         combine_knowledge=True, cfg=cfg)
    jax.block_until_ready(logit)
    assert logit.shape == (batch, T, V), logit.shape
    assert bool(jnp.all(jnp.isfinite(logit)))
    print("KERNEL_OK")
</pallas_src>

<mosaic_0001>
module attributes {stable_mosaic.version = 11 : i64} {
  func.func @gru_chunk_kernel(%arg0: i32, %arg1: i32, %arg2: memref<8x1xi32, #tpu.memory_space<vmem>>, %arg3: memref<8x128xf32, #tpu.memory_space<vmem>>, %arg4: memref<8x8x128xf32, #tpu.memory_space<vmem>>, %arg5: memref<128x384xbf16, #tpu.memory_space<vmem>>, %arg6: memref<128x384xbf16, #tpu.memory_space<vmem>>, %arg7: memref<1x384xf32, #tpu.memory_space<vmem>>, %arg8: memref<1x384xf32, #tpu.memory_space<vmem>>, %arg9: memref<8x8x128xf32, #tpu.memory_space<vmem>>, %arg10: memref<8x128xf32, #tpu.memory_space<vmem>>) attributes {dimension_semantics = [#tpu.dimension_semantics<parallel>, #tpu.dimension_semantics<arbitrary>], iteration_bounds = array<i64: 1, 1>, scalar_prefetch = 0 : i64, scratch_operands = 0 : i64, tpu.core_type = #tpu.core_type<tc>, window_params = [{transform_indices = @transform_0, window_bounds = array<i64: 8, 1>}, {transform_indices = @transform_1, window_bounds = array<i64: 8, 128>}, {transform_indices = @transform_2, window_bounds = array<i64: 8, 8, 128>}, {pipeline_mode = #tpu.pipeline_mode<synchronous>, transform_indices = @transform_3, window_bounds = array<i64: 128, 384>}, {pipeline_mode = #tpu.pipeline_mode<synchronous>, transform_indices = @transform_4, window_bounds = array<i64: 128, 384>}, {pipeline_mode = #tpu.pipeline_mode<synchronous>, transform_indices = @transform_5, window_bounds = array<i64: 1, 384>}, {pipeline_mode = #tpu.pipeline_mode<synchronous>, transform_indices = @transform_6, window_bounds = array<i64: 1, 384>}, {transform_indices = @transform_7, window_bounds = array<i64: 8, 8, 128>}, {transform_indices = @transform_8, window_bounds = array<i64: 8, 128>}]} {
    %c0_i32 = arith.constant 0 : i32
    %0 = arith.cmpi eq, %arg1, %c0_i32 : i32
    %1 = arith.extui %0 : i1 to i32
    %c0_i32_0 = arith.constant 0 : i32
    %2 = arith.cmpi ne, %1, %c0_i32_0 : i32
    scf.if %2 {
      %c0_95 = arith.constant 0 : index
      %c0_96 = arith.constant 0 : index
      %371 = vector.load %arg3[%c0_95, %c0_96] : memref<8x128xf32, #tpu.memory_space<vmem>>, vector<8x128xf32>
      %c0_97 = arith.constant 0 : index
      %c0_98 = arith.constant 0 : index
      %372 = vector.load %arg10[%c0_97, %c0_98] : memref<8x128xf32, #tpu.memory_space<vmem>>, vector<8x128xf32>
      tpu.vector_store %arg10[%c0_97, %c0_98], %371 {strides = array<i32>} : memref<8x128xf32, #tpu.memory_space<vmem>>, vector<8x128xf32>,
    } else {
    }
    %c0 = arith.constant 0 : index
    %c0_1 = arith.constant 0 : index
    %3 = vector.load %arg2[%c0, %c0_1] : memref<8x1xi32, #tpu.memory_space<vmem>>, vector<8x1xi32>
    %c0_2 = arith.constant 0 : index
    %c0_3 = arith.constant 0 : index
    %4 = vector.load %arg5[%c0_2, %c0_3] : memref<128x384xbf16, #tpu.memory_space<vmem>>, vector<128x384xbf16>
    %c0_4 = arith.constant 0 : index
    %c0_5 = arith.constant 0 : index
    %5 = vector.load %arg6[%c0_4, %c0_5] : memref<128x384xbf16, #tpu.memory_space<vmem>>, vector<128x384xbf16>
    %c0_6 = arith.constant 0 : index
    %c0_7 = arith.constant 0 : index
    %6 = vector.load %arg7[%c0_6, %c0_7] : memref<1x384xf32, #tpu.memory_space<vmem>>, vector<1x384xf32>
    %c0_8 = arith.constant 0 : index
    %c0_9 = arith.constant 0 : index
    %7 = vector.load %arg8[%c0_8, %c0_9] : memref<1x384xf32, #tpu.memory_space<vmem>>, vector<1x384xf32>
    %c0_10 = arith.constant 0 : index
    %c0_11 = arith.constant 0 : index
    %8 = vector.load %arg10[%c0_10, %c0_11] : memref<8x128xf32, #tpu.memory_space<vmem>>, vector<8x128xf32>
    %c8_i32 = arith.constant 8 : i32
    %9 = arith.muli %arg1, %c8_i32 : i32
    %c0_12 = arith.constant 0 : index
    %c0_13 = arith.constant 0 : index
    %c0_14 = arith.constant 0 : index
    %10 = vector.load %arg4[%c0_12, %c0_13, %c0_14] : memref<8x8x128xf32, #tpu.memory_space<vmem>>, vector<1x8x128xf32>
    %11 = vector.shape_cast %10 : vector<1x8x128xf32> to vector<8x128xf32>
    %12 = arith.truncf %11 : vector<8x128xf32> to vector<8x128xbf16>
    %cst = arith.constant dense<0.000000e+00> : vector<8x384xf32>
    %13 = tpu.matmul %12, %4, %cst {dimension_numbers = #tpu.dot_dimension_numbers<[1], [0], [0], [1], [0, 0, 1, 1], [], []>} : vector<8x128xbf16>, vector<128x384xbf16>, vector<8x384xf32> -> vector<8x384xf32>
    %14 = vector.broadcast %6 : vector<1x384xf32> to vector<8x384xf32>
    %15 = arith.addf %13, %14 : vector<8x384xf32>
    %16 = arith.truncf %8 : vector<8x128xf32> to vector<8x128xbf16>
    %cst_15 = arith.constant dense<0.000000e+00> : vector<8x384xf32>
    %17 = tpu.matmul %16, %5, %cst_15 {dimension_numbers = #tpu.dot_dimension_numbers<[1], [0], [0], [1], [0, 0, 1, 1], [], []>} : vector<8x128xbf16>, vector<128x384xbf16>, vector<8x384xf32> -> vector<8x384xf32>
    %18 = vector.broadcast %7 : vector<1x384xf32> to vector<8x384xf32>
    %19 = arith.addf %17, %18 : vector<8x384xf32>
    %20 = vector.extract_strided_slice %15 {offsets = [0, 0], sizes = [8, 128], strides = [1, 1]} : vector<8x384xf32> to vector<8x128xf32>
    %21 = vector.extract_strided_slice %19 {offsets = [0, 0], sizes = [8, 128], strides = [1, 1]} : vector<8x384xf32> to vector<8x128xf32>
    %22 = arith.addf %20, %21 : vector<8x128xf32>
    %23 = arith.negf %22 : vector<8x128xf32>
    %24 = math.exp %23 : vector<8x128xf32>
    %cst_16 = arith.constant 1.000000e+00 : f32
    %25 = vector.broadcast %cst_16 : f32 to vector<8x128xf32>
    %26 = arith.addf %25, %24 : vector<8x128xf32>
    %27 = arith.divf %25, %26 : vector<8x128xf32>
    %28 = vector.extract_strided_slice %15 {offsets = [0, 128], sizes = [8, 128], strides = [1, 1]} : vector<8x384xf32> to vector<8x128xf32>
    %29 = vector.extract_strided_slice %19 {offsets = [0, 128], sizes = [8, 128], strides = [1, 1]} : vector<8x384xf32> to vector<8x128xf32>
    %30 = arith.addf %28, %29 : vector<8x128xf32>
    %31 = arith.negf %30 : vector<8x128xf32>
    %32 = math.exp %31 : vector<8x128xf32>
    %cst_17 = arith.constant 1.000000e+00 : f32
    %33 = vector.broadcast %cst_17 : f32 to vector<8x128xf32>
    %34 = arith.addf %33, %32 : vector<8x128xf32>
    %35 = arith.divf %33, %34 : vector<8x128xf32>
    %36 = vector.extract_strided_slice %15 {offsets = [0, 256], sizes = [8, 128], strides = [1, 1]} : vector<8x384xf32> to vector<8x128xf32>
    %37 = vector.extract_strided_slice %19 {offsets = [0, 256], sizes = [8, 128], strides = [1, 1]} : vector<8x384xf32> to vector<8x128xf32>
    %38 = arith.mulf %27, %37 : vector<8x128xf32>
    %39 = arith.addf %36, %38 : vector<8x128xf32>
    %40 = math.tanh %39 : vector<8x128xf32>
    %cst_18 = arith.constant 1.000000e+00 : f32
    %41 = vector.broadcast %cst_18 : f32 to vector<8x128xf32>
    %42 = arith.subf %41, %35 : vector<8x128xf32>
    %43 = arith.mulf %42, %40 : vector<8x128xf32>
    %44 = arith.mulf %35, %8 : vector<8x128xf32>
    %45 = arith.addf %43, %44 : vector<8x128xf32>
    %c0_i32_19 = arith.constant 0 : i32
    %46 = arith.addi %9, %c0_i32_19 : i32
    %47 = vector.broadcast %46 : i32 to vector<8x1xi32>
    %48 = arith.cmpi slt, %47, %3 : vector<8x1xi32>
    %49 = vector.shape_cast %48 : vector<8x1xi1> to vector<8x1xi1>
    %50 = vector.broadcast %49 : vector<8x1xi1> to vector<8x128xi1>
    %51 = arith.select %50, %45, %8 : vector<8x128xi1>, vector<8x128xf32>
    %c0_20 = arith.constant 0 : index
    %c0_21 = arith.constant 0 : index
    %c0_22 = arith.constant 0 : index
    %52 = vector.load %arg9[%c0_20, %c0_21, %c0_22] : memref<8x8x128xf32, #tpu.memory_space<vmem>>, vector<1x8x128xf32>
    %53 = vector.shape_cast %52 : vector<1x8x128xf32> to vector<8x128xf32>
    %54 = vector.shape_cast %51 : vector<8x128xf32> to vector<1x8x128xf32>
    tpu.vector_store %arg9[%c0_20, %c0_21, %c0_22], %54 {strides = array<i32>} : memref<8x8x128xf32, #tpu.memory_space<vmem>>, vector<1x8x128xf32>,
    %c1 = arith.constant 1 : index
    %c0_23 = arith.constant 0 : index
    %c0_24 = arith.constant 0 : index
    %55 = vector.load %arg4[%c1, %c0_23, %c0_24] : memref<8x8x128xf32, #tpu.memory_space<vmem>>, vector<1x8x128xf32>
    %56 = vector.shape_cast %55 : vector<1x8x128xf32> to vector<8x128xf32>
    %57 = arith.truncf %56 : vector<8x128xf32> to vector<8x128xbf16>
    %cst_25 = arith.constant dense<0.000000e+00> : vector<8x384xf32>
    %58 = tpu.matmul %57, %4, %cst_25 {dimension_numbers = #tpu.dot_dimension_numbers<[1], [0], [0], [1], [0, 0, 1, 1], [], []>} : vector<8x128xbf16>, vector<128x384xbf16>, vector<8x384xf32> -> vector<8x384xf32>
    %59 = vector.broadcast %6 : vector<1x384xf32> to vector<8x384xf32>
    %60 = arith.addf %58, %59 : vector<8x384xf32>
    %61 = arith.truncf %51 : vector<8x128xf32> to vector<8x128xbf16>
    %cst_26 = arith.constant dense<0.000000e+00> : vector<8x384xf32>
    %62 = tpu.matmul %61, %5, %cst_26 {dimension_numbers = #tpu.dot_dimension_numbers<[1], [0], [0], [1], [0, 0, 1, 1], [], []>} : vector<8x128xbf16>, vector<128x384xbf16>, vector<8x384xf32> -> vector<8x384xf32>
    %63 = vector.broadcast %7 : vector<1x384xf32> to vector<8x384xf32>
    %64 = arith.addf %62, %63 : vector<8x384xf32>
    %65 = vector.extract_strided_slice %60 {offsets = [0, 0], sizes = [8, 128], strides = [1, 1]} : vector<8x384xf32> to vector<8x128xf32>
    %66 = vector.extract_strided_slice %64 {offsets = [0, 0], sizes = [8, 128], strides = [1, 1]} : vector<8x384xf32> to vector<8x128xf32>
    %67 = arith.addf %65, %66 : vector<8x128xf32>
    %68 = arith.negf %67 : vector<8x128xf32>
    %69 = math.exp %68 : vector<8x128xf32>
    %cst_27 = arith.constant 1.000000e+00 : f32
    %70 = vector.broadcast %cst_27 : f32 to vector<8x128xf32>
    %71 = arith.addf %70, %69 : vector<8x128xf32>
    %72 = arith.divf %70, %71 : vector<8x128xf32>
    %73 = vector.extract_strided_slice %60 {offsets = [0, 128], sizes = [8, 128], strides = [1, 1]} : vector<8x384xf32> to vector<8x128xf32>
    %74 = vector.extract_strided_slice %64 {offsets = [0, 128], sizes = [8, 128], strides = [1, 1]} : vector<8x384xf32> to vector<8x128xf32>
    %75 = arith.addf %73, %74 : vector<8x128xf32>
    %76 = arith.negf %75 : vector<8x128xf32>
    %77 = math.exp %76 : vector<8x128xf32>
    %cst_28 = arith.constant 1.000000e+00 : f32
    %78 = vector.broadcast %cst_28 : f32 to vector<8x128xf32>
    %79 = arith.addf %78, %77 : vector<8x128xf32>
    %80 = arith.divf %78, %79 : vector<8x128xf32>
    %81 = vector.extract_strided_slice %60 {offsets = [0, 256], sizes = [8, 128], strides = [1, 1]} : vector<8x384xf32> to vector<8x128xf32>
    %82 = vector.extract_strided_slice %64 {offsets = [0, 256], sizes = [8, 128], strides = [1, 1]} : vector<8x384xf32> to vector<8x128xf32>
    %83 = arith.mulf %72, %82 : vector<8x128xf32>
    %84 = arith.addf %81, %83 : vector<8x128xf32>
    %85 = math.tanh %84 : vector<8x128xf32>
    %cst_29 = arith.constant 1.000000e+00 : f32
    %86 = vector.broadcast %cst_29 : f32 to vector<8x128xf32>
    %87 = arith.subf %86, %80 : vector<8x128xf32>
    %88 = arith.mulf %87, %85 : vector<8x128xf32>
    %89 = arith.mulf %80, %51 : vector<8x128xf32>
    %90 = arith.addf %88, %89 : vector<8x128xf32>
    %c1_i32 = arith.constant 1 : i32
    %91 = arith.addi %9, %c1_i32 : i32
    %92 = vector.broadcast %91 : i32 to vector<8x1xi32>
    %93 = arith.cmpi slt, %92, %3 : vector<8x1xi32>
    %94 = vector.shape_cast %93 : vector<8x1xi1> to vector<8x1xi1>
    %95 = vector.broadcast %94 : vector<8x1xi1> to vector<8x128xi1>
    %96 = arith.select %95, %90, %51 : vector<8x128xi1>, vector<8x128xf32>
    %c1_30 = arith.constant 1 : index
    %c0_31 = arith.constant 0 : index
    %c0_32 = arith.constant 0 : index
    %97 = vector.load %arg9[%c1_30, %c0_31, %c0_32] : memref<8x8x128xf32, #tpu.memory_space<vmem>>, vector<1x8x128xf32>
    %98 = vector.shape_cast %97 : vector<1x8x128xf32> to vector<8x128xf32>
    %99 = vector.shape_cast %96 : vector<8x128xf32> to vector<1x8x128xf32>
    tpu.vector_store %arg9[%c1_30, %c0_31, %c0_32], %99 {strides = array<i32>} : memref<8x8x128xf32, #tpu.memory_space<vmem>>, vector<1x8x128xf32>,
    %c2 = arith.constant 2 : index
    %c0_33 = arith.constant 0 : index
    %c0_34 = arith.constant 0 : index
    %100 = vector.load %arg4[%c2, %c0_33, %c0_34] : memref<8x8x128xf32, #tpu.memory_space<vmem>>, vector<1x8x128xf32>
    %101 = vector.shape_cast %100 : vector<1x8x128xf32> to vector<8x128xf32>
    %102 = arith.truncf %101 : vector<8x128xf32> to vector<8x128xbf16>
    %cst_35 = arith.constant dense<0.000000e+00> : vector<8x384xf32>
    %103 = tpu.matmul %102, %4, %cst_35 {dimension_numbers = #tpu.dot_dimension_numbers<[1], [0], [0], [1], [0, 0, 1, 1], [], []>} : vector<8x128xbf16>, vector<128x384xbf16>, vector<8x384xf32> -> vector<8x384xf32>
    %104 = vector.broadcast %6 : vector<1x384xf32> to vector<8x384xf32>
    %105 = arith.addf %103, %104 : vector<8x384xf32>
    %106 = arith.truncf %96 : vector<8x128xf32> to vector<8x128xbf16>
    %cst_36 = arith.constant dense<0.000000e+00> : vector<8x384xf32>
    %107 = tpu.matmul %106, %5, %cst_36 {dimension_numbers = #tpu.dot_dimension_numbers<[1], [0], [0], [1], [0, 0, 1, 1], [], []>} : vector<8x128xbf16>, vector<128x384xbf16>, vector<8x384xf32> -> vector<8x384xf32>
    %108 = vector.broadcast %7 : vector<1x384xf32> to vector<8x384xf32>
    %109 = arith.addf %107, %108 : vector<8x384xf32>
    %110 = vector.extract_strided_slice %105 {offsets = [0, 0], sizes = [8, 128], strides = [1, 1]} : vector<8x384xf32> to vector<8x128xf32>
    %111 = vector.extract_strided_slice %109 {offsets = [0, 0], sizes = [8, 128], strides = [1, 1]} : vector<8x384xf32> to vector<8x128xf32>
    %112 = arith.addf %110, %111 : vector<8x128xf32>
    %113 = arith.negf %112 : vector<8x128xf32>
    %114 = math.exp %113 : vector<8x128xf32>
    %cst_37 = arith.constant 1.000000e+00 : f32
    %115 = vector.broadcast %cst_37 : f32 to vector<8x128xf32>
    %116 = arith.addf %115, %114 : vector<8x128xf32>
    %117 = arith.divf %115, %116 : vector<8x128xf32>
    %118 = vector.extract_strided_slice %105 {offsets = [0, 128], sizes = [8, 128], strides = [1, 1]} : vector<8x384xf32> to vector<8x128xf32>
    %119 = vector.extract_strided_slice %109 {offsets = [0, 128], sizes = [8, 128], strides = [1, 1]} : vector<8x384xf32> to vector<8x128xf32>
    %120 = arith.addf %118, %119 : vector<8x128xf32>
    %121 = arith.negf %120 : vector<8x128xf32>
    %122 = math.exp %121 : vector<8x128xf32>
    %cst_38 = arith.constant 1.000000e+00 : f32
    %123 = vector.broadcast %cst_38 : f32 to vector<8x128xf32>
    %124 = arith.addf %123, %122 : vector<8x128xf32>
    %125 = arith.divf %123, %124 : vector<8x128xf32>
    %126 = vector.extract_strided_slice %105 {offsets = [0, 256], sizes = [8, 128], strides = [1, 1]} : vector<8x384xf32> to vector<8x128xf32>
    %127 = vector.extract_strided_slice %109 {offsets = [0, 256], sizes = [8, 128], strides = [1, 1]} : vector<8x384xf32> to vector<8x128xf32>
    %128 = arith.mulf %117, %127 : vector<8x128xf32>
    %129 = arith.addf %126, %128 : vector<8x128xf32>
    %130 = math.tanh %129 : vector<8x128xf32>
    %cst_39 = arith.constant 1.000000e+00 : f32
    %131 = vector.broadcast %cst_39 : f32 to vector<8x128xf32>
    %132 = arith.subf %131, %125 : vector<8x128xf32>
    %133 = arith.mulf %132, %130 : vector<8x128xf32>
    %134 = arith.mulf %125, %96 : vector<8x128xf32>
    %135 = arith.addf %133, %134 : vector<8x128xf32>
    %c2_i32 = arith.constant 2 : i32
    %136 = arith.addi %9, %c2_i32 : i32
    %137 = vector.broadcast %136 : i32 to vector<8x1xi32>
    %138 = arith.cmpi slt, %137, %3 : vector<8x1xi32>
    %139 = vector.shape_cast %138 : vector<8x1xi1> to vector<8x1xi1>
    %140 = vector.broadcast %139 : vector<8x1xi1> to vector<8x128xi1>
    %141 = arith.select %140, %135, %96 : vector<8x128xi1>, vector<8x128xf32>
    %c2_40 = arith.constant 2 : index
    %c0_41 = arith.constant 0 : index
    %c0_42 = arith.constant 0 : index
    %142 = vector.load %arg9[%c2_40, %c0_41, %c0_42] : memref<8x8x128xf32, #tpu.memory_space<vmem>>, vector<1x8x128xf32>
    %143 = vector.shape_cast %142 : vector<1x8x128xf32> to vector<8x128xf32>
    %144 = vector.shape_cast %141 : vector<8x128xf32> to vector<1x8x128xf32>
    tpu.vector_store %arg9[%c2_40, %c0_41, %c0_42], %144 {strides = array<i32>} : memref<8x8x128xf32, #tpu.memory_space<vmem>>, vector<1x8x128xf32>,
    %c3 = arith.constant 3 : index
    %c0_43 = arith.constant 0 : index
    %c0_44 = arith.constant 0 : index
    %145 = vector.load %arg4[%c3, %c0_43, %c0_44] : memref<8x8x128xf32, #tpu.memory_space<vmem>>, vector<1x8x128xf32>
    %146 = vector.shape_cast %145 : vector<1x8x128xf32> to vector<8x128xf32>
    %147 = arith.truncf %146 : vector<8x128xf32> to vector<8x128xbf16>
    %cst_45 = arith.constant dense<0.000000e+00> : vector<8x384xf32>
    %148 = tpu.matmul %147, %4, %cst_45 {dimension_numbers = #tpu.dot_dimension_numbers<[1], [0], [0], [1], [0, 0, 1, 1], [], []>} : vector<8x128xbf16>, vector<128x384xbf16>, vector<8x384xf32> -> vector<8x384xf32>
    %149 = vector.broadcast %6 : vector<1x384xf32> to vector<8x384xf32>
    %150 = arith.addf %148, %149 : vector<8x384xf32>
    %151 = arith.truncf %141 : vector<8x128xf32> to vector<8x128xbf16>
    %cst_46 = arith.constant dense<0.000000e+00> : vector<8x384xf32>
    %152 = tpu.matmul %151, %5, %cst_46 {dimension_numbers = #tpu.dot_dimension_numbers<[1], [0], [0], [1], [0, 0, 1, 1], [], []>} : vector<8x128xbf16>, vector<128x384xbf16>, vector<8x384xf32> -> vector<8x384xf32>
    %153 = vector.broadcast %7 : vector<1x384xf32> to vector<8x384xf32>
    %154 = arith.addf %152, %153 : vector<8x384xf32>
    %155 = vector.extract_strided_slice %150 {offsets = [0, 0], sizes = [8, 128], strides = [1, 1]} : vector<8x384xf32> to vector<8x128xf32>
    %156 = vector.extract_strided_slice %154 {offsets = [0, 0], sizes = [8, 128], strides = [1, 1]} : vector<8x384xf32> to vector<8x128xf32>
    %157 = arith.addf %155, %156 : vector<8x128xf32>
    %158 = arith.negf %157 : vector<8x128xf32>
    %159 = math.exp %158 : vector<8x128xf32>
    %cst_47 = arith.constant 1.000000e+00 : f32
    %160 = vector.broadcast %cst_47 : f32 to vector<8x128xf32>
    %161 = arith.addf %160, %159 : vector<8x128xf32>
    %162 = arith.divf %160, %161 : vector<8x128xf32>
    %163 = vector.extract_strided_slice %150 {offsets = [0, 128], sizes = [8, 128], strides = [1, 1]} : vector<8x384xf32> to vector<8x128xf32>
    %164 = vector.extract_strided_slice %154 {offsets = [0, 128], sizes = [8, 128], strides = [1, 1]} : vector<8x384xf32> to vector<8x128xf32>
    %165 = arith.addf %163, %164 : vector<8x128xf32>
    %166 = arith.negf %165 : vector<8x128xf32>
    %167 = math.exp %166 : vector<8x128xf32>
    %cst_48 = arith.constant 1.000000e+00 : f32
    %168 = vector.broadcast %cst_48 : f32 to vector<8x128xf32>
    %169 = arith.addf %168, %167 : vector<8x128xf32>
    %170 = arith.divf %168, %169 : vector<8x128xf32>
    %171 = vector.extract_strided_slice %150 {offsets = [0, 256], sizes = [8, 128], strides = [1, 1]} : vector<8x384xf32> to vector<8x128xf32>
    %172 = vector.extract_strided_slice %154 {offsets = [0, 256], sizes = [8, 128], strides = [1, 1]} : vector<8x384xf32> to vector<8x128xf32>
    %173 = arith.mulf %162, %172 : vector<8x128xf32>
    %174 = arith.addf %171, %173 : vector<8x128xf32>
    %175 = math.tanh %174 : vector<8x128xf32>
    %cst_49 = arith.constant 1.000000e+00 : f32
    %176 = vector.broadcast %cst_49 : f32 to vector<8x128xf32>
    %177 = arith.subf %176, %170 : vector<8x128xf32>
    %178 = arith.mulf %177, %175 : vector<8x128xf32>
    %179 = arith.mulf %170, %141 : vector<8x128xf32>
    %180 = arith.addf %178, %179 : vector<8x128xf32>
    %c3_i32 = arith.constant 3 : i32
    %181 = arith.addi %9, %c3_i32 : i32
    %182 = vector.broadcast %181 : i32 to vector<8x1xi32>
    %183 = arith.cmpi slt, %182, %3 : vector<8x1xi32>
    %184 = vector.shape_cast %183 : vector<8x1xi1> to vector<8x1xi1>
    %185 = vector.broadcast %184 : vector<8x1xi1> to vector<8x128xi1>
    %186 = arith.select %185, %180, %141 : vector<8x128xi1>, vector<8x128xf32>
    %c3_50 = arith.constant 3 : index
    %c0_51 = arith.constant 0 : index
    %c0_52 = arith.constant 0 : index
    %187 = vector.load %arg9[%c3_50, %c0_51, %c0_52] : memref<8x8x128xf32, #tpu.memory_space<vmem>>, vector<1x8x128xf32>
    %188 = vector.shape_cast %187 : vector<1x8x128xf32> to vector<8x128xf32>
    %189 = vector.shape_cast %186 : vector<8x128xf32> to vector<1x8x128xf32>
    tpu.vector_store %arg9[%c3_50, %c0_51, %c0_52], %189 {strides = array<i32>} : memref<8x8x128xf32, #tpu.memory_space<vmem>>, vector<1x8x128xf32>,
    %c4 = arith.constant 4 : index
    %c0_53 = arith.constant 0 : index
    %c0_54 = arith.constant 0 : index
    %190 = vector.load %arg4[%c4, %c0_53, %c0_54] : memref<8x8x128xf32, #tpu.memory_space<vmem>>, vector<1x8x128xf32>
    %191 = vector.shape_cast %190 : vector<1x8x128xf32> to vector<8x128xf32>
    %192 = arith.truncf %191 : vector<8x128xf32> to vector<8x128xbf16>
    %cst_55 = arith.constant dense<0.000000e+00> : vector<8x384xf32>
    %193 = tpu.matmul %192, %4, %cst_55 {dimension_numbers = #tpu.dot_dimension_numbers<[1], [0], [0], [1], [0, 0, 1, 1], [], []>} : vector<8x128xbf16>, vector<128x384xbf16>, vector<8x384xf32> -> vector<8x384xf32>
    %194 = vector.broadcast %6 : vector<1x384xf32> to vector<8x384xf32>
    %195 = arith.addf %193, %194 : vector<8x384xf32>
    %196 = arith.truncf %186 : vector<8x128xf32> to vector<8x128xbf16>
    %cst_56 = arith.constant dense<0.000000e+00> : vector<8x384xf32>
    %197 = tpu.matmul %196, %5, %cst_56 {dimension_numbers = #tpu.dot_dimension_numbers<[1], [0], [0], [1], [0, 0, 1, 1], [], []>} : vector<8x128xbf16>, vector<128x384xbf16>, vector<8x384xf32> -> vector<8x384xf32>
    %198 = vector.broadcast %7 : vector<1x384xf32> to vector<8x384xf32>
    %199 = arith.addf %197, %198 : vector<8x384xf32>
    %200 = vector.extract_strided_slice %195 {offsets = [0, 0], sizes = [8, 128], strides = [1, 1]} : vector<8x384xf32> to vector<8x128xf32>
    %201 = vector.extract_strided_slice %199 {offsets = [0, 0], sizes = [8, 128], strides = [1, 1]} : vector<8x384xf32> to vector<8x128xf32>
    %202 = arith.addf %200, %201 : vector<8x128xf32>
    %203 = arith.negf %202 : vector<8x128xf32>
    %204 = math.exp %203 : vector<8x128xf32>
    %cst_57 = arith.constant 1.000000e+00 : f32
    %205 = vector.broadcast %cst_57 : f32 to vector<8x128xf32>
    %206 = arith.addf %205, %204 : vector<8x128xf32>
    %207 = arith.divf %205, %206 : vector<8x128xf32>
    %208 = vector.extract_strided_slice %195 {offsets = [0, 128], sizes = [8, 128], strides = [1, 1]} : vector<8x384xf32> to vector<8x128xf32>
    %209 = vector.extract_strided_slice %199 {offsets = [0, 128], sizes = [8, 128], strides = [1, 1]} : vector<8x384xf32> to vector<8x128xf32>
    %210 = arith.addf %208, %209 : vector<8x128xf32>
    %211 = arith.negf %210 : vector<8x128xf32>
    %212 = math.exp %211 : vector<8x128xf32>
    %cst_58 = arith.constant 1.000000e+00 : f32
    %213 = vector.broadcast %cst_58 : f32 to vector<8x128xf32>
    %214 = arith.addf %213, %212 : vector<8x128xf32>
    %215 = arith.divf %213, %214 : vector<8x128xf32>
    %216 = vector.extract_strided_slice %195 {offsets = [0, 256], sizes = [8, 128], strides = [1, 1]} : vector<8x384xf32> to vector<8x128xf32>
    %217 = vector.extract_strided_slice %199 {offsets = [0, 256], sizes = [8, 128], strides = [1, 1]} : vector<8x384xf32> to vector<8x128xf32>
    %218 = arith.mulf %207, %217 : vector<8x128xf32>
    %219 = arith.addf %216, %218 : vector<8x128xf32>
    %220 = math.tanh %219 : vector<8x128xf32>
    %cst_59 = arith.constant 1.000000e+00 : f32
    %221 = vector.broadcast %cst_59 : f32 to vector<8x128xf32>
    %222 = arith.subf %221, %215 : vector<8x128xf32>
    %223 = arith.mulf %222, %220 : vector<8x128xf32>
    %224 = arith.mulf %215, %186 : vector<8x128xf32>
    %225 = arith.addf %223, %224 : vector<8x128xf32>
    %c4_i32 = arith.constant 4 : i32
    %226 = arith.addi %9, %c4_i32 : i32
    %227 = vector.broadcast %226 : i32 to vector<8x1xi32>
    %228 = arith.cmpi slt, %227, %3 : vector<8x1xi32>
    %229 = vector.shape_cast %228 : vector<8x1xi1> to vector<8x1xi1>
    %230 = vector.broadcast %229 : vector<8x1xi1> to vector<8x128xi1>
    %231 = arith.select %230, %225, %186 : vector<8x128xi1>, vector<8x128xf32>
    %c4_60 = arith.constant 4 : index
    %c0_61 = arith.constant 0 : index
    %c0_62 = arith.constant 0 : index
    %232 = vector.load %arg9[%c4_60, %c0_61, %c0_62] : memref<8x8x128xf32, #tpu.memory_space<vmem>>, vector<1x8x128xf32>
    %233 = vector.shape_cast %232 : vector<1x8x128xf32> to vector<8x128xf32>
    %234 = vector.shape_cast %231 : vector<8x128xf32> to vector<1x8x128xf32>
    tpu.vector_store %arg9[%c4_60, %c0_61, %c0_62], %234 {strides = array<i32>} : memref<8x8x128xf32, #tpu.memory_space<vmem>>, vector<1x8x128xf32>,
    %c5 = arith.constant 5 : index
    %c0_63 = arith.constant 0 : index
    %c0_64 = arith.constant 0 : index
    %235 = vector.load %arg4[%c5, %c0_63, %c0_64] : memref<8x8x128xf32, #tpu.memory_space<vmem>>, vector<1x8x128xf32>
    %236 = vector.shape_cast %235 : vector<1x8x128xf32> to vector<8x128xf32>
    %237 = arith.truncf %236 : vector<8x128xf32> to vector<8x128xbf16>
    %cst_65 = arith.constant dense<0.000000e+00> : vector<8x384xf32>
    %238 = tpu.matmul %237, %4, %cst_65 {dimension_numbers = #tpu.dot_dimension_numbers<[1], [0], [0], [1], [0, 0, 1, 1], [], []>} : vector<8x128xbf16>, vector<128x384xbf16>, vector<8x384xf32> -> vector<8x384xf32>
    %239 = vector.broadcast %6 : vector<1x384xf32> to vector<8x384xf32>
    %240 = arith.addf %238, %239 : vector<8x384xf32>
    %241 = arith.truncf %231 : vector<8x128xf32> to vector<8x128xbf16>
    %cst_66 = arith.constant dense<0.000000e+00> : vector<8x384xf32>
    %242 = tpu.matmul %241, %5, %cst_66 {dimension_numbers = #tpu.dot_dimension_numbers<[1], [0], [0], [1], [0, 0, 1, 1], [], []>} : vector<8x128xbf16>, vector<128x384xbf16>, vector<8x384xf32> -> vector<8x384xf32>
    %243 = vector.broadcast %7 : vector<1x384xf32> to vector<8x384xf32>
    %244 = arith.addf %242, %243 : vector<8x384xf32>
    %245 = vector.extract_strided_slice %240 {offsets = [0, 0], sizes = [8, 128], strides = [1, 1]} : vector<8x384xf32> to vector<8x128xf32>
    %246 = vector.extract_strided_slice %244 {offsets = [0, 0], sizes = [8, 128], strides = [1, 1]} : vector<8x384xf32> to vector<8x128xf32>
    %247 = arith.addf %245, %246 : vector<8x128xf32>
    %248 = arith.negf %247 : vector<8x128xf32>
    %249 = math.exp %248 : vector<8x128xf32>
    %cst_67 = arith.constant 1.000000e+00 : f32
    %250 = vector.broadcast %cst_67 : f32 to vector<8x128xf32>
    %251 = arith.addf %250, %249 : vector<8x128xf32>
    %252 = arith.divf %250, %251 : vector<8x128xf32>
    %253 = vector.extract_strided_slice %240 {offsets = [0, 128], sizes = [8, 128], strides = [1, 1]} : vector<8x384xf32> to vector<8x128xf32>
    %254 = vector.extract_strided_slice %244 {offsets = [0, 128], sizes = [8, 128], strides = [1, 1]} : vector<8x384xf32> to vector<8x128xf32>
    %255 = arith.addf %253, %254 : vector<8x128xf32>
    %256 = arith.negf %255 : vector<8x128xf32>
    %257 = math.exp %256 : vector<8x128xf32>
    %cst_68 = arith.constant 1.000000e+00 : f32
    %258 = vector.broadcast %cst_68 : f32 to vector<8x128xf32>
    %259 = arith.addf %258, %257 : vector<8x128xf32>
    %260 = arith.divf %258, %259 : vector<8x128xf32>
    %261 = vector.extract_strided_slice %240 {offsets = [0, 256], sizes = [8, 128], strides = [1, 1]} : vector<8x384xf32> to vector<8x128xf32>
    %262 = vector.extract_strided_slice %244 {offsets = [0, 256], sizes = [8, 128], strides = [1, 1]} : vector<8x384xf32> to vector<8x128xf32>
    %263 = arith.mulf %252, %262 : vector<8x128xf32>
    %264 = arith.addf %261, %263 : vector<8x128xf32>
    %265 = math.tanh %264 : vector<8x128xf32>
    %cst_69 = arith.constant 1.000000e+00 : f32
    %266 = vector.broadcast %cst_69 : f32 to vector<8x128xf32>
    %267 = arith.subf %266, %260 : vector<8x128xf32>
    %268 = arith.mulf %267, %265 : vector<8x128xf32>
    %269 = arith.mulf %260, %231 : vector<8x128xf32>
    %270 = arith.addf %268, %269 : vector<8x128xf32>
    %c5_i32 = arith.constant 5 : i32
    %271 = arith.addi %9, %c5_i32 : i32
    %272 = vector.broadcast %271 : i32 to vector<8x1xi32>
    %273 = arith.cmpi slt, %272, %3 : vector<8x1xi32>
    %274 = vector.shape_cast %273 : vector<8x1xi1> to vector<8x1xi1>
    %275 = vector.broadcast %274 : vector<8x1xi1> to vector<8x128xi1>
    %276 = arith.select %275, %270, %231 : vector<8x128xi1>, vector<8x128xf32>
    %c5_70 = arith.constant 5 : index
    %c0_71 = arith.constant 0 : index
    %c0_72 = arith.constant 0 : index
    %277 = vector.load %arg9[%c5_70, %c0_71, %c0_72] : memref<8x8x128xf32, #tpu.memory_space<vmem>>, vector<1x8x128xf32>
    %278 = vector.shape_cast %277 : vector<1x8x128xf32> to vector<8x128xf32>
    %279 = vector.shape_cast %276 : vector<8x128xf32> to vector<1x8x128xf32>
    tpu.vector_store %arg9[%c5_70, %c0_71, %c0_72], %279 {strides = array<i32>} : memref<8x8x128xf32, #tpu.memory_space<vmem>>, vector<1x8x128xf32>,
    %c6 = arith.constant 6 : index
    %c0_73 = arith.constant 0 : index
    %c0_74 = arith.constant 0 : index
    %280 = vector.load %arg4[%c6, %c0_73, %c0_74] : memref<8x8x128xf32, #tpu.memory_space<vmem>>, vector<1x8x128xf32>
    %281 = vector.shape_cast %280 : vector<1x8x128xf32> to vector<8x128xf32>
    %282 = arith.truncf %281 : vector<8x128xf32> to vector<8x128xbf16>
    %cst_75 = arith.constant dense<0.000000e+00> : vector<8x384xf32>
    %283 = tpu.matmul %282, %4, %cst_75 {dimension_numbers = #tpu.dot_dimension_numbers<[1], [0], [0], [1], [0, 0, 1, 1], [], []>} : vector<8x128xbf16>, vector<128x384xbf16>, vector<8x384xf32> -> vector<8x384xf32>
    %284 = vector.broadcast %6 : vector<1x384xf32> to vector<8x384xf32>
    %285 = arith.addf %283, %284 : vector<8x384xf32>
    %286 = arith.truncf %276 : vector<8x128xf32> to vector<8x128xbf16>
    %cst_76 = arith.constant dense<0.000000e+00> : vector<8x384xf32>
    %287 = tpu.matmul %286, %5, %cst_76 {dimension_numbers = #tpu.dot_dimension_numbers<[1], [0], [0], [1], [0, 0, 1, 1], [], []>} : vector<8x128xbf16>, vector<128x384xbf16>, vector<8x384xf32> -> vector<8x384xf32>
    %288 = vector.broadcast %7 : vector<1x384xf32> to vector<8x384xf32>
    %289 = arith.addf %287, %288 : vector<8x384xf32>
    %290 = vector.extract_strided_slice %285 {offsets = [0, 0], sizes = [8, 128], strides = [1, 1]} : vector<8x384xf32> to vector<8x128xf32>
    %291 = vector.extract_strided_slice %289 {offsets = [0, 0], sizes = [8, 128], strides = [1, 1]} : vector<8x384xf32> to vector<8x128xf32>
    %292 = arith.addf %290, %291 : vector<8x128xf32>
    %293 = arith.negf %292 : vector<8x128xf32>
    %294 = math.exp %293 : vector<8x128xf32>
    %cst_77 = arith.constant 1.000000e+00 : f32
    %295 = vector.broadcast %cst_77 : f32 to vector<8x128xf32>
    %296 = arith.addf %295, %294 : vector<8x128xf32>
    %297 = arith.divf %295, %296 : vector<8x128xf32>
    %298 = vector.extract_strided_slice %285 {offsets = [0, 128], sizes = [8, 128], strides = [1, 1]} : vector<8x384xf32> to vector<8x128xf32>
    %299 = vector.extract_strided_slice %289 {offsets = [0, 128], sizes = [8, 128], strides = [1, 1]} : vector<8x384xf32> to vector<8x128xf32>
    %300 = arith.addf %298, %299 : vector<8x128xf32>
    %301 = arith.negf %300 : vector<8x128xf32>
    %302 = math.exp %301 : vector<8x128xf32>
    %cst_78 = arith.constant 1.000000e+00 : f32
    %303 = vector.broadcast %cst_78 : f32 to vector<8x128xf32>
    %304 = arith.addf %303, %302 : vector<8x128xf32>
    %305 = arith.divf %303, %304 : vector<8x128xf32>
    %306 = vector.extract_strided_slice %285 {offsets = [0, 256], sizes = [8, 128], strides = [1, 1]} : vector<8x384xf32> to vector<8x128xf32>
    %307 = vector.extract_strided_slice %289 {offsets = [0, 256], sizes = [8, 128], strides = [1, 1]} : vector<8x384xf32> to vector<8x128xf32>
    %308 = arith.mulf %297, %307 : vector<8x128xf32>
    %309 = arith.addf %306, %308 : vector<8x128xf32>
    %310 = math.tanh %309 : vector<8x128xf32>
    %cst_79 = arith.constant 1.000000e+00 : f32
    %311 = vector.broadcast %cst_79 : f32 to vector<8x128xf32>
    %312 = arith.subf %311, %305 : vector<8x128xf32>
    %313 = arith.mulf %312, %310 : vector<8x128xf32>
    %314 = arith.mulf %305, %276 : vector<8x128xf32>
    %315 = arith.addf %313, %314 : vector<8x128xf32>
    %c6_i32 = arith.constant 6 : i32
    %316 = arith.addi %9, %c6_i32 : i32
    %317 = vector.broadcast %316 : i32 to vector<8x1xi32>
    %318 = arith.cmpi slt, %317, %3 : vector<8x1xi32>
    %319 = vector.shape_cast %318 : vector<8x1xi1> to vector<8x1xi1>
    %320 = vector.broadcast %319 : vector<8x1xi1> to vector<8x128xi1>
    %321 = arith.select %320, %315, %276 : vector<8x128xi1>, vector<8x128xf32>
    %c6_80 = arith.constant 6 : index
    %c0_81 = arith.constant 0 : index
    %c0_82 = arith.constant 0 : index
    %322 = vector.load %arg9[%c6_80, %c0_81, %c0_82] : memref<8x8x128xf32, #tpu.memory_space<vmem>>, vector<1x8x128xf32>
    %323 = vector.shape_cast %322 : vector<1x8x128xf32> to vector<8x128xf32>
    %324 = vector.shape_cast %321 : vector<8x128xf32> to vector<1x8x128xf32>
    tpu.vector_store %arg9[%c6_80, %c0_81, %c0_82], %324 {strides = array<i32>} : memref<8x8x128xf32, #tpu.memory_space<vmem>>, vector<1x8x128xf32>,
    %c7 = arith.constant 7 : index
    %c0_83 = arith.constant 0 : index
    %c0_84 = arith.constant 0 : index
    %325 = vector.load %arg4[%c7, %c0_83, %c0_84] : memref<8x8x128xf32, #tpu.memory_space<vmem>>, vector<1x8x128xf32>
    %326 = vector.shape_cast %325 : vector<1x8x128xf32> to vector<8x128xf32>
    %327 = arith.truncf %326 : vector<8x128xf32> to vector<8x128xbf16>
    %cst_85 = arith.constant dense<0.000000e+00> : vector<8x384xf32>
    %328 = tpu.matmul %327, %4, %cst_85 {dimension_numbers = #tpu.dot_dimension_numbers<[1], [0], [0], [1], [0, 0, 1, 1], [], []>} : vector<8x128xbf16>, vector<128x384xbf16>, vector<8x384xf32> -> vector<8x384xf32>
    %329 = vector.broadcast %6 : vector<1x384xf32> to vector<8x384xf32>
    %330 = arith.addf %328, %329 : vector<8x384xf32>
    %331 = arith.truncf %321 : vector<8x128xf32> to vector<8x128xbf16>
    %cst_86 = arith.constant dense<0.000000e+00> : vector<8x384xf32>
    %332 = tpu.matmul %331, %5, %cst_86 {dimension_numbers = #tpu.dot_dimension_numbers<[1], [0], [0], [1], [0, 0, 1, 1], [], []>} : vector<8x128xbf16>, vector<128x384xbf16>, vector<8x384xf32> -> vector<8x384xf32>
    %333 = vector.broadcast %7 : vector<1x384xf32> to vector<8x384xf32>
    %334 = arith.addf %332, %333 : vector<8x384xf32>
    %335 = vector.extract_strided_slice %330 {offsets = [0, 0], sizes = [8, 128], strides = [1, 1]} : vector<8x384xf32> to vector<8x128xf32>
    %336 = vector.extract_strided_slice %334 {offsets = [0, 0], sizes = [8, 128], strides = [1, 1]} : vector<8x384xf32> to vector<8x128xf32>
    %337 = arith.addf %335, %336 : vector<8x128xf32>
    %338 = arith.negf %337 : vector<8x128xf32>
    %339 = math.exp %338 : vector<8x128xf32>
    %cst_87 = arith.constant 1.000000e+00 : f32
    %340 = vector.broadcast %cst_87 : f32 to vector<8x128xf32>
    %341 = arith.addf %340, %339 : vector<8x128xf32>
    %342 = arith.divf %340, %341 : vector<8x128xf32>
    %343 = vector.extract_strided_slice %330 {offsets = [0, 128], sizes = [8, 128], strides = [1, 1]} : vector<8x384xf32> to vector<8x128xf32>
    %344 = vector.extract_strided_slice %334 {offsets = [0, 128], sizes = [8, 128], strides = [1, 1]} : vector<8x384xf32> to vector<8x128xf32>
    %345 = arith.addf %343, %344 : vector<8x128xf32>
    %346 = arith.negf %345 : vector<8x128xf32>
    %347 = math.exp %346 : vector<8x128xf32>
    %cst_88 = arith.constant 1.000000e+00 : f32
    %348 = vector.broadcast %cst_88 : f32 to vector<8x128xf32>
    %349 = arith.addf %348, %347 : vector<8x128xf32>
    %350 = arith.divf %348, %349 : vector<8x128xf32>
    %351 = vector.extract_strided_slice %330 {offsets = [0, 256], sizes = [8, 128], strides = [1, 1]} : vector<8x384xf32> to vector<8x128xf32>
    %352 = vector.extract_strided_slice %334 {offsets = [0, 256], sizes = [8, 128], strides = [1, 1]} : vector<8x384xf32> to vector<8x128xf32>
    %353 = arith.mulf %342, %352 : vector<8x128xf32>
    %354 = arith.addf %351, %353 : vector<8x128xf32>
    %355 = math.tanh %354 : vector<8x128xf32>
    %cst_89 = arith.constant 1.000000e+00 : f32
    %356 = vector.broadcast %cst_89 : f32 to vector<8x128xf32>
    %357 = arith.subf %356, %350 : vector<8x128xf32>
    %358 = arith.mulf %357, %355 : vector<8x128xf32>
    %359 = arith.mulf %350, %321 : vector<8x128xf32>
    %360 = arith.addf %358, %359 : vector<8x128xf32>
    %c7_i32 = arith.constant 7 : i32
    %361 = arith.addi %9, %c7_i32 : i32
    %362 = vector.broadcast %361 : i32 to vector<8x1xi32>
    %363 = arith.cmpi slt, %362, %3 : vector<8x1xi32>
    %364 = vector.shape_cast %363 : vector<8x1xi1> to vector<8x1xi1>
    %365 = vector.broadcast %364 : vector<8x1xi1> to vector<8x128xi1>
    %366 = arith.select %365, %360, %321 : vector<8x128xi1>, vector<8x128xf32>
    %c7_90 = arith.constant 7 : index
    %c0_91 = arith.constant 0 : index
    %c0_92 = arith.constant 0 : index
    %367 = vector.load %arg9[%c7_90, %c0_91, %c0_92] : memref<8x8x128xf32, #tpu.memory_space<vmem>>, vector<1x8x128xf32>
    %368 = vector.shape_cast %367 : vector<1x8x128xf32> to vector<8x128xf32>
    %369 = vector.shape_cast %366 : vector<8x128xf32> to vector<1x8x128xf32>
    tpu.vector_store %arg9[%c7_90, %c0_91, %c0_92], %369 {strides = array<i32>} : memref<8x8x128xf32, #tpu.memory_space<vmem>>, vector<1x8x128xf32>,
    %c0_93 = arith.constant 0 : index
    %c0_94 = arith.constant 0 : index
    %370 = vector.load %arg10[%c0_93, %c0_94] : memref<8x128xf32, #tpu.memory_space<vmem>>, vector<8x128xf32>
    tpu.vector_store %arg10[%c0_93, %c0_94], %366 {strides = array<i32>} : memref<8x128xf32, #tpu.memory_space<vmem>>, vector<8x128xf32>,
    return
  }
  func.func @transform_0(%arg0: i32, %arg1: i32) -> (i32, i32) {
    %c0_i32 = arith.constant 0 : i32
    %c0_i32_0 = arith.constant 0 : i32
    return %arg0, %c0_i32 : i32, i32
  }
  func.func @transform_1(%arg0: i32, %arg1: i32) -> (i32, i32) {
    %c0_i32 = arith.constant 0 : i32
    %c0_i32_0 = arith.constant 0 : i32
    return %arg0, %c0_i32 : i32, i32
  }
  func.func @transform_2(%arg0: i32, %arg1: i32) -> (i32, i32, i32) {
    %c0_i32 = arith.constant 0 : i32
    %c0_i32_0 = arith.constant 0 : i32
    return %arg1, %arg0, %c0_i32 : i32, i32, i32
  }
  func.func @transform_3(%arg0: i32, %arg1: i32) -> (i32, i32) {
    %c0_i32 = arith.constant 0 : i32
    %c0_i32_0 = arith.constant 0 : i32
    %c0_i32_1 = arith.constant 0 : i32
    return %c0_i32, %c0_i32_0 : i32, i32
  }
  func.func @transform_4(%arg0: i32, %arg1: i32) -> (i32, i32) {
    %c0_i32 = arith.constant 0 : i32
    %c0_i32_0 = arith.constant 0 : i32
    %c0_i32_1 = arith.constant 0 : i32
    return %c0_i32, %c0_i32_0 : i32, i32
  }
  func.func @transform_5(%arg0: i32, %arg1: i32) -> (i32, i32) {
    %c0_i32 = arith.constant 0 : i32
    %c0_i32_0 = arith.constant 0 : i32
    %c0_i32_1 = arith.constant 0 : i32
    return %c0_i32, %c0_i32_0 : i32, i32
  }
  func.func @transform_6(%arg0: i32, %arg1: i32) -> (i32, i32) {
    %c0_i32 = arith.constant 0 : i32
    %c0_i32_0 = arith.constant 0 : i32
    %c0_i32_1 = arith.constant 0 : i32
    return %c0_i32, %c0_i32_0 : i32, i32
  }
  func.func @transform_7(%arg0: i32, %arg1: i32) -> (i32, i32, i32) {
    %c0_i32 = arith.constant 0 : i32
    %c0_i32_0 = arith.constant 0 : i32
    return %arg1, %arg0, %c0_i32 : i32, i32, i32
  }
  func.func @transform_8(%arg0: i32, %arg1: i32) -> (i32, i32) {
    %c0_i32 = arith.constant 0 : i32
    %c0_i32_0 = arith.constant 0 : i32
    return %arg0, %c0_i32 : i32, i32
  }
}

</mosaic_0001>

<bundles_post_ra>
// kernel: tpu_custom_call.1
= control target key start
LH: loop header
LB: loop body
LE: loop exit
PB: predicated region body
PF: predicated region fallthrough
CT: control target
= control target key end

     0   :  { %14 = vsyncpa [#allocation3], 0  ;;  %s4180_s0 = inlined_call_operand.hbm [shape: s32[8,1], index: 0, kind: input, shape index: {}]   ;;  %s4181_s1 = inlined_call_operand.hbm [shape: f32[8,128], index: 1, kind: input, shape index: {}]   ;;  %s4182_s2 = inlined_call_operand.hbm [shape: f32[8,8,128], index: 2, kind: input, shape index: {}]   ;;  %s4183_s3 = inlined_call_operand.hbm [shape: bf16[128,384], index: 3, kind: input, shape index: {}]   ;;  %s4184_s4 = inlined_call_operand.hbm [shape: bf16[128,384], index: 4, kind: input, shape index: {}]   ;;  %s4185_s5 = inlined_call_operand.hbm [shape: f32[1,384], index: 5, kind: input, shape index: {}]   ;;  %s4186_s6 = inlined_call_operand.hbm [shape: f32[1,384], index: 6, kind: input, shape index: {}]   ;;  %s4187_s7 = inlined_call_operand.hbm [shape: f32[8,8,128], index: 7, kind: output, shape index: {0}]   ;;  %s4188_s8 = inlined_call_operand.hbm [shape: f32[8,128], index: 8, kind: output, shape index: {1}]  }
   0x1   :  { %15 = vsyncpa [#allocation6], 0 }
   0x2   :  { %16 = vsyncpa [#allocation9], 0 }
   0x3   :  { %17 = vsyncpa [#allocation12], 0 }
   0x4   :  { %18 = vsyncpa [#allocation4], 0 }
   0x5   :  { %19 = vsyncpa [#allocation16], 0  ;;  %s3117_s27 = smov [#allocation5]   ;;  %s3118_s29 = smov [#allocation8]  }
   0x6   :  { %s36_s28 = sshll.u32 %s3117_s27, 4  ;;  %s57_s30 = sshll.u32 %s3118_s29, 4  ;;  %s37_s28 = int_to_ptr.vmem [resolvable:$true] %s36_s28  ;;  %s3178_s30 = int_to_ptr.vmem [resolvable:$true] %s57_s30 }
   0x7   :  { %s2907_s11 = scalar_lea.hbm %s4181_s1, 128 }
   0x8   :  { %p2908_p0 = scmp.ne.s32.totalorder %s4181_s1, %s2907_s11  ;;  %p2911_p1 = scmp.lt.u32.totalorder %s2907_s11, %s4181_s1 }
   0xa   :  { %p2913_p2 = pnand %p2911_p1, %p2908_p0 }
   0xc   :  { %2916 = shalt.err (!%p2913_p2)
}
   0xd   :  { %s2917_s16 = scalar_lea.vmem %s37_s28, 128  ;;  %p2922_p4 = scmp.lt.s32.totalorder %s37_s28, %s37_s28 }
   0xe   :  { %p2918_p3 = scmp.ne.s32.totalorder %s37_s28, %s2917_s16  ;;  %p2923_p5 = scmp.lt.s32.totalorder %s2917_s16, %s2917_s16 }
  0x10   :  { %p2924_p6 = por %p2923_p5, %p2922_p4 }
  0x12   :  { %p2925_p7 = pnand %p2924_p6, %p2918_p3 }
  0x14   :  { %2928 = shalt.err (!%p2925_p7)
}
  0x15   :  { %39 = dma.hbm_to_vmem [thread:$0]  %s4181_s1, 128, %s37_s28, [#allocation6]  }
  0x16   :  { %s2929_s21 = scalar_lea.hbm %s4183_s3, 3072 }
  0x17   :  { %p2930_p8 = scmp.ne.s32.totalorder %s4183_s3, %s2929_s21  ;;  %p2933_p9 = scmp.lt.u32.totalorder %s2929_s21, %s4183_s3 }
  0x19   :  { %p2935_p10 = pnand %p2933_p9, %p2930_p8 }
  0x1b   :  { %2938 = shalt.err (!%p2935_p10)
}
  0x1c   :  { %s2939_s26 = scalar_lea.vmem %s3178_s30, 3072  ;;  %p2944_p12 = scmp.lt.s32.totalorder %s3178_s30, %s3178_s30 }
  0x1d   :  { %p2940_p11 = scmp.ne.s32.totalorder %s3178_s30, %s2939_s26  ;;  %p2945_p13 = scmp.lt.s32.totalorder %s2939_s26, %s2939_s26 }
  0x1f   :  { %p2946_p0 = por %p2945_p13, %p2944_p12 }
  0x21   :  { %p2947_p1 = pnand %p2946_p0, %p2940_p11 }
  0x23   :  { %2950 = shalt.err (!%p2947_p1)
}
  0x24   :  { %s3119_s1 = smov 192   ;;  %s3120_s27 = smov 12  }
  0x25   :  { %63 = dma.hbm_to_vmem [thread:$0]  %s4183_s3, 3072, %s3178_s30, [#allocation9], %s3119_s1, %s3119_s1, %s3120_s27  }
  0x26   :  { %s3121_s9 = smov [#allocation11]   ;;  %s3122_s11 = smov [#allocation2]  }
  0x27   :  { %s82_s10 = sshll.u32 %s3121_s9, 4  ;;  %s26_s12 = sshll.u32 %s3122_s11, 4  ;;  %s83_s10 = int_to_ptr.vmem [resolvable:$true] %s82_s10  ;;  %s27_s12 = int_to_ptr.vmem [resolvable:$true] %s26_s12 }
  0x28   :  { %s2951_s15 = scalar_lea.hbm %s4185_s5, 48 }
  0x29   :  { %p2952_p2 = scmp.ne.s32.totalorder %s4185_s5, %s2951_s15  ;;  %p2955_p3 = scmp.lt.u32.totalorder %s2951_s15, %s4185_s5 }
  0x2b   :  { %p2957_p4 = pnand %p2955_p3, %p2952_p2 }
  0x2d   :  { %2960 = shalt.err (!%p2957_p4)
}
  0x2e   :  { %s2961_s3 = scalar_lea.vmem %s83_s10, 48  ;;  %s2965_s30 = scalar_lea.vmem %s83_s10, 64 }
  0x2f   :  { %p2962_p5 = scmp.ne.s32.totalorder %s83_s10, %s2961_s3  ;;  %p2966_p6 = scmp.lt.s32.totalorder %s83_s10, %s83_s10 }
  0x30   :  { %p2967_p7 = scmp.lt.s32.totalorder %s2965_s30, %s2961_s3 }
  0x32   :  { %p2968_p8 = por %p2967_p7, %p2966_p6 }
  0x34   :  { %p2969_p9 = pnand %p2968_p8, %p2962_p5 }
  0x36   :  { %2972 = shalt.err (!%p2969_p9)
}
  0x37   :  { %85 = dma.hbm_to_vmem [thread:$0]  %s4185_s5, 48, %s83_s10, [#allocation12]  }
  0x38   :  { %s2973_s24 = scalar_lea.hbm %s4180_s0, 128 }
  0x39   :  { %p2974_p10 = scmp.ne.s32.totalorder %s4180_s0, %s2973_s24  ;;  %p2977_p11 = scmp.lt.u32.totalorder %s2973_s24, %s4180_s0 }
  0x3b   :  { %p2979_p12 = pnand %p2977_p11, %p2974_p10 }
  0x3d   :  { %2982 = shalt.err (!%p2979_p12)
}
  0x3e   :  { %s2983_s9 = scalar_lea.vmem %s27_s12, 128  ;;  %p2988_p0 = scmp.lt.s32.totalorder %s27_s12, %s27_s12 }
  0x3f   :  { %p2984_p13 = scmp.ne.s32.totalorder %s27_s12, %s2983_s9  ;;  %p2989_p1 = scmp.lt.s32.totalorder %s2983_s9, %s2983_s9 }
  0x41   :  { %p2990_p2 = por %p2989_p1, %p2988_p0 }
  0x43   :  { %p2991_p3 = pnand %p2990_p2, %p2984_p13 }
  0x45   :  { %2994 = shalt.err (!%p2991_p3)
}
  0x46   :  { %29 = dma.hbm_to_vmem [thread:$0]  %s4180_s0, 128, %s27_s12, [#allocation3]  }
  0x47   :  { %s3123_s11 = smov [#allocation7]   ;;  %s2995_s16 = scalar_lea.hbm %s4182_s2, 1024 }
  0x48   :  { %s45_s13 = sshll.u32 %s3123_s11, 4  ;;  %p2996_p4 = scmp.ne.s32.totalorder %s4182_s2, %s2995_s16  ;;  %s46_s13 = int_to_ptr.vmem [resolvable:$true] %s45_s13 }
  0x49   :  { %p2999_p5 = scmp.lt.u32.totalorder %s2995_s16, %s4182_s2 }
  0x4b   :  { %p3001_p6 = pnand %p2999_p5, %p2996_p4 }
  0x4d   :  { %3004 = shalt.err (!%p3001_p6)
}
  0x4e   :  { %s3005_s30 = scalar_lea.vmem %s46_s13, 1024  ;;  %p3010_p8 = scmp.lt.s32.totalorder %s46_s13, %s46_s13 }
  0x4f   :  { %p3006_p7 = scmp.ne.s32.totalorder %s46_s13, %s3005_s30  ;;  %p3011_p9 = scmp.lt.s32.totalorder %s3005_s30, %s3005_s30 }
  0x51   :  { %p3012_p10 = por %p3011_p9, %p3010_p8 }
  0x53   :  { %p3013_p11 = pnand %p3012_p10, %p3006_p7 }
  0x55   :  { %3016 = shalt.err (!%p3013_p11)
}
  0x56   :  { %s3124_s0 = smov 128   ;;  %s3125_s12 = smov 8  }
  0x57   :  { %51 = dma.hbm_to_vmem [thread:$0]  %s4182_s2, 1024, %s46_s13, [#allocation6], %s3124_s0, %s3124_s0, %s3125_s12  }
  0x58   :  { %s3126_s22 = smov [#allocation10]   ;;  %s3127_s24 = smov [#allocation13]  }
  0x59   :  { %s69_s23 = sshll.u32 %s3126_s22, 4  ;;  %s92_s25 = sshll.u32 %s3127_s24, 4  ;;  %s70_s23 = int_to_ptr.vmem [resolvable:$true] %s69_s23  ;;  %s93_s25 = int_to_ptr.vmem [resolvable:$true] %s92_s25 }
  0x5a   :  { %s3017_s29 = scalar_lea.hbm %s4184_s4, 3072 }
  0x5b   :  { %p3018_p12 = scmp.ne.s32.totalorder %s4184_s4, %s3017_s29  ;;  %p3021_p13 = scmp.lt.u32.totalorder %s3017_s29, %s4184_s4 }
  0x5d   :  { %p3023_p0 = pnand %p3021_p13, %p3018_p12 }
  0x5f   :  { %3026 = shalt.err (!%p3023_p0)
}
  0x60   :  { %s3027_s2 = scalar_lea.vmem %s70_s23, 3072  ;;  %p3032_p2 = scmp.lt.s32.totalorder %s70_s23, %s70_s23 }
  0x61   :  { %p3028_p1 = scmp.ne.s32.totalorder %s70_s23, %s3027_s2  ;;  %p3033_p3 = scmp.lt.s32.totalorder %s3027_s2, %s3027_s2 }
  0x63   :  { %p3034_p4 = por %p3033_p3, %p3032_p2 }
  0x65   :  { %p3035_p5 = pnand %p3034_p4, %p3028_p1 }
  0x67   :  { %3038 = shalt.err (!%p3035_p5)
}
  0x68   :  { %75 = dma.hbm_to_vmem [thread:$0]  %s4184_s4, 3072, %s70_s23, [#allocation9], %s3119_s1, %s3119_s1, %s3120_s27  }
  0x69   :  { %s3039_s17 = scalar_lea.hbm %s4186_s6, 48 }
  0x6a   :  { %p3040_p6 = scmp.ne.s32.totalorder %s4186_s6, %s3039_s17  ;;  %p3043_p7 = scmp.lt.u32.totalorder %s3039_s17, %s4186_s6 }
  0x6c   :  { %p3045_p8 = pnand %p3043_p7, %p3040_p6 }
  0x6e   :  { %3048 = shalt.err (!%p3045_p8)
}
  0x6f   :  { %s3049_s20 = scalar_lea.vmem %s93_s25, 48  ;;  %s3053_s21 = scalar_lea.vmem %s93_s25, 64 }
  0x70   :  { %p3050_p9 = scmp.ne.s32.totalorder %s93_s25, %s3049_s20  ;;  %p3054_p10 = scmp.lt.s32.totalorder %s93_s25, %s93_s25 }
  0x71   :  { %p3055_p11 = scmp.lt.s32.totalorder %s3053_s21, %s3049_s20 }
  0x73   :  { %p3056_p12 = por %p3055_p11, %p3054_p10 }
  0x75   :  { %p3057_p13 = pnand %p3056_p12, %p3050_p9 }
  0x77   :  { %3060 = shalt.err (!%p3057_p13)
}
  0x78   :  { %95 = dma.hbm_to_vmem [thread:$0]  %s4186_s6, 48, %s93_s25, [#allocation12]  }
  0x79   :  { %3105 = dma.done.wait [#allocation3], 128  }
  0x7a   :  { %3106 = vsyncadd [#allocation3], 4294967168 }
  0x7b   :  { %3107 = dma.done.wait [#allocation6], 1152  }
  0x7c   :  { %3108 = vsyncadd [#allocation6], 4294966144 }
  0x7d   :  { %3109 = dma.done.wait [#allocation9], 6144  }
  0x7e   :  { %3110 = vsyncadd [#allocation9], 4294961152 }
  0x7f   :  { %3111 = dma.done.wait [#allocation12], 96  }
  0x80   :  { %3112 = vsyncadd [#allocation12], 4294967200  ;;  %v4198_v0 = vmov 0.0   ;;  %v4189_v1 = vmov 0   ;;  %vm3130_vm0 = vmmov 0   ;;  %v193_v23 = vld [vmem:[#allocation7] sm:$0xff] }
  0x81   :  { %2313 = vmatprep.subr.bf16.mxu1 %v4198_v0  ;;  %371 = vmatprep.mubr.bf16.mxu0 %v4189_v1  ;;  %v3284_v2 = vld [vmem:[#allocation8 + $0x4] ss:$12 sps:$4 sm:$0xff]   ;;  %v3286_v3 = vld [vmem:[#allocation8] ss:$12 sps:$4 sm:$0xff]   ;;  %v3289_v4 = vld [vmem:[#allocation8 + $0x1c] ss:$12 sps:$4 sm:$0xff]   ;;  %v194_v26 = vpack.c.bf16 %v193_v23, %v193_v23 }
  0x82   :  { %2329 = vmatprep.mubr.msk.bf16.mxu1 %vm3130_vm0, %v4198_v0  ;;  %2713 = vset.pattern.permute.xlu0 %v4189_v1  ;;  %4229 = vst [vmem:[#allocation23_spill] sm:$0xff] %v3284_v2  ;;  %v3292_v5 = vld [vmem:[#allocation8 + $0x18] ss:$12 sps:$4 sm:$0xff]   ;;  %v3295_v6 = vld [vmem:[#allocation8 + $0x34] ss:$12 sps:$4 sm:$0xff]   ;;  %v677_v59 = vld [vmem:[#allocation7 + $0x8] sm:$0xff] }
  0x83   :  { %2714 = vset.pattern.permute.xlu1 %v4189_v1  ;;  %339 = vmatprep.subr.bf16.mxu0 %v3284_v2  ;;  %v3298_v7 = vld [vmem:[#allocation8 + $0x30] ss:$12 sps:$4 sm:$0xff]   ;;  %v3301_v8 = vld [vmem:[#allocation8 + $0x4c] ss:$12 sps:$4 sm:$0xff]   ;;  %v3303_v9 = vld [vmem:[#allocation8 + $0x8] ss:$12 sps:$4 sm:$0xff]   ;;  %v678_v60 = vpack.c.bf16 %v677_v59, %v677_v59 }
  0x84   :  { %340 = vmatpush1.bf16.msra.mxu0 %v3286_v3  ;;  %v3306_v10 = vld [vmem:[#allocation8 + $0x48] ss:$12 sps:$4 sm:$0xff]   ;;  %2314 = vmatpush3.bf16.msra.mxu1 %v3303_v9  ;;  %v3310_v11 = vld [vmem:[#allocation8 + $0x64] ss:$12 sps:$4 sm:$0xff]   ;;  %v3313_v12 = vld [vmem:[#allocation8 + $0x20] ss:$12 sps:$4 sm:$0xff]  }
  0x85   :  { %341 = vmatprep.subr.bf16.mxu0 %v3289_v4  ;;  %2315 = vmatprep.subr.bf16.mxu1 %v4198_v0  ;;  %v3315_v13 = vld [vmem:[#allocation8 + $0x60] ss:$12 sps:$4 sm:$0xff]   ;;  %v3319_v14 = vld [vmem:[#allocation8 + $0x38] ss:$12 sps:$4 sm:$0xff]   ;;  %v3322_v15 = vld [vmem:[#allocation8 + $0x7c] ss:$12 sps:$4 sm:$0xff]  }
  0x86   :  { %v3326_v16 = vld [vmem:[#allocation8 + $0x78] ss:$12 sps:$4 sm:$0xff]   ;;  %v3329_v17 = vld [vmem:[#allocation8 + $0x50] ss:$12 sps:$4 sm:$0xff]   ;;  %v3332_v18 = vld [vmem:[#allocation8 + $0x94] ss:$12 sps:$4 sm:$0xff]  }
  0x87   :  { %v3335_v19 = vld [vmem:[#allocation8 + $0x90] ss:$12 sps:$4 sm:$0xff]   ;;  %v3339_v20 = vld [vmem:[#allocation8 + $0x68] ss:$12 sps:$4 sm:$0xff]   ;;  %v3342_v21 = vld [vmem:[#allocation8 + $0xac] ss:$12 sps:$4 sm:$0xff]  }
  0x88   :  { %342 = vmatpush1.bf16.msra.mxu0 %v3292_v5  ;;  %2316 = vmatpush3.bf16.msra.mxu1 %v3313_v12  ;;  %v3345_v22 = vld [vmem:[#allocation8 + $0xa8] ss:$12 sps:$4 sm:$0xff]   ;;  %v3349_v24 = vld [vmem:[#allocation8 + $0x80] ss:$12 sps:$4 sm:$0xff]   ;;  %v3352_v25 = vld [vmem:[#allocation10 + $0x4] ss:$12 sps:$4 sm:$0xff]  }
  0x89   :  { %343 = vmatprep.subr.bf16.mxu0 %v3295_v6  ;;  %2317 = vmatprep.subr.bf16.mxu1 %v4198_v0  ;;  %v3356_v27 = vld [vmem:[#allocation10] ss:$12 sps:$4 sm:$0xff]   ;;  %v3359_v28 = vld [vmem:[#allocation8 + $0x98] ss:$12 sps:$4 sm:$0xff]   ;;  %v3362_v29 = vld [vmem:[#allocation10 + $0x1c] ss:$12 sps:$4 sm:$0xff]  }
  0x8a   :  { %v3365_v30 = vld [vmem:[#allocation10 + $0x18] ss:$12 sps:$4 sm:$0xff]   ;;  %v3369_v31 = vld [vmem:[#allocation8 + $0xb0] ss:$12 sps:$4 sm:$0xff]   ;;  %v3372_v32 = vld [vmem:[#allocation10 + $0x34] ss:$12 sps:$4 sm:$0xff]  }
  0x8b   :  { %v3376_v33 = vld [vmem:[#allocation2] sm:$0xff]  ;;  %v3387_v36 = vld [vmem:[#allocation10 + $0x4c] ss:$12 sps:$4 sm:$0xff]   ;;  %v3414_v45 = vld [vmem:[#allocation10 + $0x7c] ss:$12 sps:$4 sm:$0xff]   ;;  %s3131_s6 = smov [#allocation14]  }
  0x8c   :  { %344 = vmatpush1.bf16.msra.mxu0 %v3298_v7  ;;  %2318 = vmatpush3.bf16.msra.mxu1 %v3319_v14  ;;  %4230 = vst [vmem:[#allocation24_spill] sm:$0xff] %v3376_v33  ;;  %v3379_v34 = vld [vmem:[#allocation10 + $0x30] ss:$12 sps:$4 sm:$0xff]   ;;  %v3382_v35 = vld [vmem:[#allocation10 + $0x8] ss:$12 sps:$4 sm:$0xff]   ;;  %vm2147_vm1 = vcmp.gt.s32.totalorder %v3376_v33, 0 }
  0x8d   :  { %345 = vmatprep.subr.bf16.mxu0 %v3301_v8  ;;  %2319 = vmatprep.subr.bf16.mxu1 %v4198_v0  ;;  %vm2150_vm2 = vcmp.gt.s32.totalorder %v3376_v33, 1  ;;  %v669_v37 = vsel %vm2147_vm1, 1, %v4189_v1  ;;  %v3393_v39 = vld [vmem:[#allocation10 + $0x48] ss:$12 sps:$4 sm:$0xff]   ;;  %v3396_v40 = vld [vmem:[#allocation10 + $0x20] ss:$12 sps:$4 sm:$0xff]  }
  0x8e   :  { %671 = vperm.xlu0 %2713, %v669_v37   ;;  %v866_v38 = vsel %vm2150_vm2, 1, %v4189_v1  ;;  %vm2159_vm3 = vcmp.gt.s32.totalorder %v3376_v33, 4  ;;  %v3400_v41 = vld [vmem:[#allocation10 + $0x64] ss:$12 sps:$4 sm:$0xff]   ;;  %v3407_v43 = vld [vmem:[#allocation10 + $0x60] ss:$12 sps:$4 sm:$0xff]  }
  0x8f   :  { %v1460_v42 = vsel %vm2159_vm3, 1, %v4189_v1  ;;  %v3410_v44 = vld [vmem:[#allocation10 + $0x38] ss:$12 sps:$4 sm:$0xff]   ;;  %vm2165_vm4 = vcmp.gt.s32.totalorder %v3376_v33, 6  ;;  %v3422_v48 = vld [vmem:[#allocation10 + $0x50] ss:$12 sps:$4 sm:$0xff]  }
  0x90   :  { %346 = vmatpush1.bf16.msra.mxu0 %v3306_v10  ;;  %2320 = vmatpush3.bf16.msra.mxu1 %v3329_v17  ;;  %v1856_v46 = vsel %vm2165_vm4, 1, %v4189_v1  ;;  %v3419_v47 = vld [vmem:[#allocation10 + $0x78] ss:$12 sps:$4 sm:$0xff]   ;;  %v3425_v49 = vld [vmem:[#allocation10 + $0x94] ss:$12 sps:$4 sm:$0xff]   ;;  %s2068_s27 = sshll.u32 %s3131_s6, 4  ;;  %s2069_s27 = int_to_ptr.vmem [resolvable:$true] %s2068_s27 }
  0x91   :  { %347 = vmatprep.subr.bf16.mxu0 %v3310_v11  ;;  %2321 = vmatprep.subr.bf16.mxu1 %v4198_v0  ;;  %4231 = vst [vmem:[#allocation25_spill] sm:$0xff] %v3419_v47  ;;  %4232 = vst [vmem:[#allocation26_spill] sm:$0xff] %v3425_v49  ;;  %v3429_v50 = vld [vmem:[#allocation10 + $0x90] ss:$12 sps:$4 sm:$0xff]   ;;  %v3432_v51 = vld [vmem:[#allocation10 + $0x68] ss:$12 sps:$4 sm:$0xff]   ;;  %p3066_p1 = scmp.lt.s32.totalorder %s2069_s27, %s2069_s27 }
  0x92   :  { %868 = vperm.xlu0 %2713, %v866_v38   ;;  %4233 = vst [vmem:[#allocation27_spill] sm:$0xff] %v3429_v50  ;;  %v3435_v52 = vld [vmem:[#allocation10 + $0xac] ss:$12 sps:$4 sm:$0xff]   ;;  %v3439_v53 = vld [vmem:[#allocation10 + $0xa8] ss:$12 sps:$4 sm:$0xff]   ;;  %s3132_s22 = smov [#allocation15]  }
  0x93   :  { %4234 = vst [vmem:[#allocation28_spill] sm:$0xff] %v3435_v52  ;;  %4235 = vst [vmem:[#allocation29_spill] sm:$0xff] %v3439_v53  ;;  %v3441_v54 = vld [vmem:[#allocation5] sm:$0xff]  ;;  %v3444_v55 = vld [vmem:[#allocation10 + $0x80] ss:$12 sps:$4 sm:$0xff]   ;;  %s2081_s23 = sshll.u32 %s3132_s22, 4  ;;  %s2082_s23 = int_to_ptr.vmem [resolvable:$true] %s2081_s23 }
  0x94   :  { %348 = vmatpush1.bf16.msra.mxu0 %v3315_v13  ;;  %2322 = vmatpush3.bf16.msra.mxu1 %v3339_v20  ;;  %4236 = vst [vmem:[#allocation30_spill] sm:$0xff] %v3444_v55  ;;  %v420_v56 = vpack.c.bf16 %v3441_v54, %v3441_v54  ;;  %v3452_v57 = vld [vmem:[#allocation10 + $0x98] ss:$12 sps:$4 sm:$0xff]   ;;  %v3457_v58 = vld [vmem:[#allocation10 + $0xb0] ss:$12 sps:$4 sm:$0xff]   ;;  %s3061_s24 = scalar_lea.vmem %s2069_s27, 1024 }
  0x95   :  { %349 = vmatprep.subr.bf16.mxu0 %v3322_v15  ;;  %2323 = vmatprep.subr.bf16.mxu1 %v4198_v0  ;;  %4237 = vst [vmem:[#allocation31_spill] sm:$0xff] %v3452_v57  ;;  %4238 = vst [vmem:[#allocation32_spill] sm:$0xff] %v3457_v58  ;;  %p3062_p0 = scmp.ne.s32.totalorder %s2069_s27, %s3061_s24  ;;  %p3067_p2 = scmp.lt.s32.totalorder %s3061_s24, %s3061_s24 }
  0x96   :  { %1462 = vperm.xlu0 %2713, %v1460_v42   ;;  %v190_v42 = vld [vmem:[#allocation13] sm:$0x7] }
  0x97   :  { %p3068_p3 = por %p3067_p2, %p3066_p1 }
  0x98   :  { %350 = vmatpush1.bf16.msra.mxu0 %v3326_v16  ;;  %2324 = vmatpush3.bf16.msra.mxu1 %v3349_v24 }
  0x99   :  { %351 = vmatprep.subr.bf16.mxu0 %v3332_v18  ;;  %2325 = vmatprep.subr.bf16.mxu1 %v4198_v0  ;;  %p3069_p4 = pnand %p3068_p3, %p3062_p0 }
  0x9a   :  { %1858 = vperm.xlu0 %2713, %v1856_v46   ;;  %v189_v46 = vld [vmem:[#allocation11] sm:$0x7] }
  0x9c   :  { %352 = vmatpush1.bf16.msra.mxu0 %v3335_v19  ;;  %2326 = vmatpush3.bf16.msra.mxu1 %v3359_v28 }
  0x9d   :  { %353 = vmatprep.subr.bf16.mxu0 %v3342_v21  ;;  %2327 = vmatprep.subr.bf16.mxu1 %v4198_v0 }
  0xa0   :  { %354 = vmatpush1.bf16.msra.mxu0 %v3345_v22  ;;  %2328 = vmatpush3.bf16.msra.mxu1 %v3369_v31 }
  0xa1   :  { %565 = vmatprep.subr.bf16.mxu0 %v3352_v25  ;;  %2333 = vmatprep.subr.bf16.mxu1 %v4198_v0 }
  0xa3   :  { %372 = vmatmul.mubr.bf16.vlgmr.msra.gmra.mrb[0].mxu0 %v194_v26  ;;  %2330 = vmatmul.mubr.bf16.vlgmr.msra.gmra.mrb[0].mxu1 %v194_v26  ;;  %v196_v26 = vlaneseq }
  0xa4   :  { %566 = vmatpush1.bf16.msra.mxu0 %v3356_v27  ;;  %597 = vmatprep.mubr.bf16.mxu0 %v4189_v1 }
  0xa5   :  { %567 = vmatprep.subr.bf16.mxu0 %v3362_v29  ;;  %2334 = vmatpush3.bf16.msra.mxu1 %v3382_v35  ;;  %v197_v37 = vshrl.u32 %v196_v26, 7 }
  0xa6   :  { %2335 = vmatprep.subr.bf16.mxu1 %v4198_v0  ;;  %2349 = vmatprep.mubr.msk.bf16.mxu1 %vm3130_vm0, %v4198_v0 }
  0xa7   :  { %v198_v38 = vsub.s32 0, %v197_v37 }
  0xa8   :  { %568 = vmatpush1.bf16.msra.mxu0 %v3365_v30 }
  0xa9   :  { %569 = vmatprep.subr.bf16.mxu0 %v3372_v32  ;;  %2336 = vmatpush3.bf16.msra.mxu1 %v3396_v40  ;;  %v199_v59 = vrot.slane %v189_v46, %v198_v38 }
  0xaa   :  { %2337 = vmatprep.subr.bf16.mxu1 %v4198_v0 }
  0xac   :  { %570 = vmatpush1.bf16.msra.mxu0 %v3379_v34 }
  0xad   :  { %571 = vmatprep.subr.bf16.mxu0 %v3387_v36  ;;  %2338 = vmatpush3.bf16.msra.mxu1 %v3410_v44 }
  0xae   :  { %2339 = vmatprep.subr.bf16.mxu1 %v4198_v0 }
  0xb0   :  { %572 = vmatpush1.bf16.msra.mxu0 %v3393_v39 }
  0xb1   :  { %573 = vmatprep.subr.bf16.mxu0 %v3400_v41  ;;  %2340 = vmatpush3.bf16.msra.mxu1 %v3422_v48 }
  0xb2   :  { %2341 = vmatprep.subr.bf16.mxu1 %v4198_v0 }
  0xb4   :  { %574 = vmatpush1.bf16.msra.mxu0 %v3407_v43 }
  0xb5   :  { %575 = vmatprep.subr.bf16.mxu0 %v3414_v45  ;;  %2342 = vmatpush3.bf16.msra.mxu1 %v3432_v51 }
  0xb6   :  { %2343 = vmatprep.subr.bf16.mxu1 %v4198_v0 }
  0xb8   :  { %576 = vmatpush1.bf16.msra.mxu0 %v3419_v47 }
  0xb9   :  { %577 = vmatprep.subr.bf16.mxu0 %v3425_v49  ;;  %2344 = vmatpush3.bf16.msra.mxu1 %v3444_v55 }
  0xba   :  { %2345 = vmatprep.subr.bf16.mxu1 %v4198_v0 }
  0xbc   :  { %578 = vmatpush1.bf16.msra.mxu0 %v3429_v50 }
  0xbd   :  { %579 = vmatprep.subr.bf16.mxu0 %v3435_v52  ;;  %2346 = vmatpush3.bf16.msra.mxu1 %v3452_v57 }
  0xbe   :  { %2347 = vmatprep.subr.bf16.mxu1 %v4198_v0 }
  0xc0   :  { %580 = vmatpush1.bf16.msra.mxu0 %v3439_v53 }
  0xc1   :  { %679 = vmatprep.subr.bf16.mxu0 %v3284_v2  ;;  %2348 = vmatpush3.bf16.msra.mxu1 %v3457_v58 }
  0xc2   :  { %2353 = vmatprep.subr.bf16.mxu1 %v4198_v0 }
  0xc3   :  { %598 = vmatmul.mubr.bf16.vlgmr.msra.gmra.mrb[0].mxu0 %v420_v56 }
  0xc4   :  { %680 = vmatpush1.bf16.msra.mxu0 %v3286_v3  ;;  %711 = vmatprep.mubr.bf16.mxu0 %v4189_v1 }
  0xc5   :  { %681 = vmatprep.subr.bf16.mxu0 %v3289_v4  ;;  %2350 = vmatmul.mubr.bf16.vlgmr.msra.gmra.mrb[4].mxu1 %v420_v56  ;;  %v202_v56 = vsub.s32 1, %v197_v37 }
  0xc6   :  { %2354 = vmatpush3.bf16.msra.mxu1 %v3303_v9  ;;  %2369 = vmatprep.mubr.msk.bf16.mxu1 %vm3130_vm0, %v4198_v0 }
  0xc7   :  { %2355 = vmatprep.subr.bf16.mxu1 %v4198_v0  ;;  %v429_v33 = vrot.slane %v190_v42, %v202_v56 }
  0xc8   :  { %682 = vmatpush1.bf16.msra.mxu0 %v3292_v5 }
  0xc9   :  { %683 = vmatprep.subr.bf16.mxu0 %v3295_v6 }
  0xca   :  { %2356 = vmatpush3.bf16.msra.mxu1 %v3313_v12 }
  0xcb   :  { %2357 = vmatprep.subr.bf16.mxu1 %v4198_v0 }
  0xcc   :  { %684 = vmatpush1.bf16.msra.mxu0 %v3298_v7 }
  0xcd   :  { %685 = vmatprep.subr.bf16.mxu0 %v3301_v8 }
  0xce   :  { %2358 = vmatpush3.bf16.msra.mxu1 %v3319_v14 }
  0xcf   :  { %2359 = vmatprep.subr.bf16.mxu1 %v4198_v0 }
  0xd0   :  { %686 = vmatpush1.bf16.msra.mxu0 %v3306_v10 }
  0xd1   :  { %687 = vmatprep.subr.bf16.mxu0 %v3310_v11 }
  0xd2   :  { %2360 = vmatpush3.bf16.msra.mxu1 %v3329_v17 }
  0xd3   :  { %2361 = vmatprep.subr.bf16.mxu1 %v4198_v0 }
  0xd4   :  { %688 = vmatpush1.bf16.msra.mxu0 %v3315_v13 }
  0xd5   :  { %689 = vmatprep.subr.bf16.mxu0 %v3322_v15 }
  0xd6   :  { %2362 = vmatpush3.bf16.msra.mxu1 %v3339_v20 }
  0xd7   :  { %2363 = vmatprep.subr.bf16.mxu1 %v4198_v0 }
  0xd8   :  { %690 = vmatpush1.bf16.msra.mxu0 %v3326_v16 }
  0xd9   :  { %691 = vmatprep.subr.bf16.mxu0 %v3332_v18 }
  0xda   :  { %2364 = vmatpush3.bf16.msra.mxu1 %v3349_v24 }
  0xdb   :  { %2365 = vmatprep.subr.bf16.mxu1 %v4198_v0 }
  0xdc   :  { %692 = vmatpush1.bf16.msra.mxu0 %v3335_v19 }
  0xdd   :  { %693 = vmatprep.subr.bf16.mxu0 %v3342_v21 }
  0xde   :  { %2366 = vmatpush3.bf16.msra.mxu1 %v3359_v28 }
  0xdf   :  { %2367 = vmatprep.subr.bf16.mxu1 %v4198_v0 }
  0xe0   :  { %694 = vmatpush1.bf16.msra.mxu0 %v3345_v22 }
  0xe1   :  { %761 = vmatprep.subr.bf16.mxu0 %v3352_v25 }
  0xe2   :  { %2368 = vmatpush3.bf16.msra.mxu1 %v3369_v31 }
  0xe3   :  { %2373 = vmatprep.subr.bf16.mxu1 %v4198_v0  ;;  %712 = vmatmul.mubr.bf16.vlgmr.msra.gmra.mrb[4].mxu0 %v678_v60 }
  0xe4   :  { %762 = vmatpush1.bf16.msra.mxu0 %v3356_v27  ;;  %793 = vmatprep.mubr.bf16.mxu0 %v4189_v1  ;;  %v203_v1 = vrot.slane %v189_v46, %v202_v56 }
  0xe5   :  { %2370 = vmatmul.mubr.bf16.vlgmr.msra.gmra.mrb[8].mxu1 %v678_v60  ;;  %763 = vmatprep.subr.bf16.mxu0 %v3362_v29  ;;  %v425_v60 = vrot.slane %v190_v42, %v198_v38 }
  0xe6   :  { %2374 = vmatpush3.bf16.msra.mxu1 %v3382_v35  ;;  %2389 = vmatprep.mubr.msk.bf16.mxu1 %vm3130_vm0, %v4198_v0 }
  0xe7   :  { %2375 = vmatprep.subr.bf16.mxu1 %v4198_v0 }
  0xe8   :  { %764 = vmatpush1.bf16.msra.mxu0 %v3365_v30 }
  0xe9   :  { %765 = vmatprep.subr.bf16.mxu0 %v3372_v32 }
  0xea   :  { %2376 = vmatpush3.bf16.msra.mxu1 %v3396_v40 }
  0xeb   :  { %2377 = vmatprep.subr.bf16.mxu1 %v4198_v0 }
  0xec   :  { %766 = vmatpush1.bf16.msra.mxu0 %v3379_v34 }
  0xed   :  { %767 = vmatprep.subr.bf16.mxu0 %v3387_v36 }
  0xee   :  { %2378 = vmatpush3.bf16.msra.mxu1 %v3410_v44 }
  0xef   :  { %2379 = vmatprep.subr.bf16.mxu1 %v4198_v0 }
  0xf0   :  { %768 = vmatpush1.bf16.msra.mxu0 %v3393_v39 }
  0xf1   :  { %769 = vmatprep.subr.bf16.mxu0 %v3400_v41 }
  0xf2   :  { %2380 = vmatpush3.bf16.msra.mxu1 %v3422_v48 }
  0xf3   :  { %2381 = vmatprep.subr.bf16.mxu1 %v4198_v0 }
  0xf4   :  { %770 = vmatpush1.bf16.msra.mxu0 %v3407_v43 }
  0xf5   :  { %771 = vmatprep.subr.bf16.mxu0 %v3414_v45 }
  0xf6   :  { %2382 = vmatpush3.bf16.msra.mxu1 %v3432_v51 }
  0xf7   :  { %2383 = vmatprep.subr.bf16.mxu1 %v4198_v0 }
  0xf8   :  { %772 = vmatpush1.bf16.msra.mxu0 %v3419_v47 }
  0xf9   :  { %773 = vmatprep.subr.bf16.mxu0 %v3425_v49 }
  0xfa   :  { %2384 = vmatpush3.bf16.msra.mxu1 %v3444_v55 }
  0xfb   :  { %2385 = vmatprep.subr.bf16.mxu1 %v4198_v0 }
  0xfc   :  { %774 = vmatpush1.bf16.msra.mxu0 %v3429_v50 }
  0xfd   :  { %775 = vmatprep.subr.bf16.mxu0 %v3435_v52 }
  0xfe   :  { %2386 = vmatpush3.bf16.msra.mxu1 %v3452_v57 }
  0xff   :  { %2387 = vmatprep.subr.bf16.mxu1 %v4198_v0 }
 0x100   :  { %776 = vmatpush1.bf16.msra.mxu0 %v3439_v53  ;;  %v3532_v53 = vadd.f32 %v425_v60, %v199_v59 }
 0x101   :  { %877 = vmatprep.subr.bf16.mxu0 %v3284_v2  ;;  %v3534_v2 = vadd.f32 %v429_v33, %v203_v1  ;;  %v206_v1 = vsub.s32 2, %v197_v37 }
 0x102   :  { %2388 = vmatpush3.bf16.msra.mxu1 %v3457_v58 }
 0x103   :  { %2393 = vmatprep.subr.bf16.mxu1 %v4198_v0  ;;  %v3538_v33 = vrot.slane %v190_v42, %v206_v1  ;;  %v3540_v60 = vrot.slane %v189_v46, %v206_v1 }
 0x176   :  { %v414_v61 = vpop.f32.mrb[0].mxu1 }
 0x177   :  { %v2331_v62 = vpop.f32.mrb[1].mxu1 }
 0x178   :  { %v417_v63 = vpop.f32.mrb[2].mxu1 }
 0x179   :  { %v2332_v23 = vpop.f32.mrb[3].mxu1 }
 0x196   :  { %v599_v58 = vpop.f32.mrb[0].mxu0 }
 0x197   :  { %v2634_v0 = vadd.f32 %v3532_v53, %v599_v58  ;;  %v601_v62 = vpop.f32.mrb[1].mxu0 }
 0x198   :  { %v603_v63 = vpop.f32.mrb[2].mxu0  ;;  %v2636_v26 = vadd.f32 %v3534_v2, %v601_v62  ;;  %v640_v50 = vpop.f32.mrb[4].mxu1 }
 0x199   :  { %v2145_v23 = vmul.f32 -1.442695, %v2634_v0  ;;  %v604_v52 = vpop.f32.mrb[3].mxu0  ;;  %v2351_v49 = vpop.f32.mrb[5].mxu1  ;;  %v415_v63 = vadd.f32 %v414_v61, %v3540_v60  ;;  %v4239_v61 = vmov 0.0  }
 0x19a   :  { %v2146_v57 = vmul.f32 -1.442695, %v2636_v26  ;;  %v643_v38 = vpop.f32.mrb[6].mxu1  ;;  %v641_v52 = vadd.f32 %v640_v50, %v3538_v33 }
 0x19b   :  { %2779 = vpow2.f32 %v2145_v23  ;;  %v2352_v55 = vpop.f32.mrb[7].mxu1  ;;  %v672_v38 = vpop.permute.xlu0 %671 }
 0x19c   :  { %2781 = vpow2.f32 %v2146_v57  ;;  %vm673_vm5 = vcmp.eq.s32.totalorder %v672_v38, 1  ;;  %v4247_v38 = vld [vmem:[#allocation32_spill] sm:$0xff] }
 0x1a5   :  { %v2780_v56 = vpop.eup %2779 }
 0x1a6   :  { %v650_v59 = vadd.f32 1.0, %v2780_v56  ;;  %v2782_v58 = vpop.eup %2781 }
 0x1a7   :  { %v657_v0 = vadd.f32 1.0, %v2782_v58 }
 0x1a8   :  { %2783 = vrcp.f32 %v650_v59  ;;  %v4240_v59 = vmov 0  }
 0x1a9   :  { %2785 = vrcp.f32 %v657_v0 }
 0x1b2   :  { %v2784_v62 = vpop.eup %2783 }
 0x1b3   :  { %v660_v49 = vmul.f32 %v2784_v62, %v641_v52  ;;  %v2786_v55 = vpop.eup %2785  ;;  %v875_v52 = vld [vmem:[#allocation7 + $0x10] sm:$0xff] }
 0x1b4   :  { %v663_v57 = vsub.f32 1.0, %v2786_v55  ;;  %v665_v42 = vmul.f32 %v2786_v55, %v3441_v54  ;;  %v876_v62 = vpack.c.bf16 %v875_v52, %v875_v52  ;;  %v4244_v55 = vld [vmem:[#allocation31_spill] sm:$0xff] }
 0x1b5   :  { %v661_v23 = vadd.f32 %v660_v49, %v415_v63  ;;  %v4241_v63 = vld [vmem:[#allocation30_spill] sm:$0xff] }
 0x1b6   :  { %v4242_v49 = vld [vmem:[#allocation26_spill] sm:$0xff] }
 0x1b7   :  { %2787 = vtanh.f32 %v661_v23  ;;  %v4243_v23 = vld [vmem:[#allocation27_spill] sm:$0xff] }
 0x1c1   :  { %v2788_v26 = vpop.eup %2787 }
 0x1c2   :  { %v664_v37 = vmul.f32 %v2788_v26, %v663_v57  ;;  %v4245_v57 = vld [vmem:[#allocation28_spill] sm:$0xff]  ;;  %v4246_v26 = vld [vmem:[#allocation29_spill] sm:$0xff] }
 0x1c4   :  { %v666_v46 = vadd.f32 %v665_v42, %v664_v37  ;;  %v4248_v37 = vld [vmem:[#allocation23_spill] sm:$0xff]  ;;  %v4249_v42 = vld [vmem:[#allocation24_spill] sm:$0xff] }
 0x1c5   :  { %vm2153_vm6 = vcmp.gt.s32.totalorder %v4249_v42, 2  ;;  %vm2156_vm7 = vcmp.gt.s32.totalorder %v4249_v42, 3  ;;  %vm2162_vm8 = vcmp.gt.s32.totalorder %v4249_v42, 5  ;;  %vm2168_vm9 = vcmp.gt.s32.totalorder %v4249_v42, 7 }
 0x1c6   :  { %v3546_v56 = vsel %vm673_vm5, %v666_v46, %v3441_v54  ;;  %v3586_v54 = vpop.f32.mrb[8].mxu1  ;;  %v1064_v46 = vsel %vm2153_vm6, 1, %v4240_v59 }
 0x1c7   :  { %675 = vst [vmem:[#allocation14] sm:$0xff] %v3546_v56  ;;  %v760_v50 = vpack.c.bf16 %v3546_v56, %v3546_v56  ;;  %v2371_v1 = vpop.f32.mrb[9].mxu1  ;;  %1066 = vperm.xlu1 %2714, %v1064_v46  }
 0x1c8   :  { %v757_v58 = vpop.f32.mrb[10].mxu1  ;;  %v1658_v1 = vsel %vm2162_vm8, 1, %v4240_v59 }
 0x1c9   :  { %794 = vmatmul.mubr.bf16.vlgmr.msra.gmra.mrb[4].mxu0 %v760_v50  ;;  %2390 = vmatmul.mubr.bf16.vlgmr.msra.gmra.mrb[12].mxu1 %v760_v50  ;;  %v2372_v0 = vpop.f32.mrb[11].mxu1  ;;  %v1262_v50 = vsel %vm2156_vm7, 1, %v4240_v59  ;;  %v2054_v58 = vsel %vm2168_vm9, 1, %v4240_v59 }
 0x1ca   :  { %878 = vmatpush1.bf16.msra.mxu0 %v3286_v3  ;;  %2394 = vmatpush3.bf16.msra.mxu1 %v3303_v9 }
 0x1cb   :  { %879 = vmatprep.subr.bf16.mxu0 %v3289_v4  ;;  %2395 = vmatprep.subr.bf16.mxu1 %v4239_v61 }
 0x1cc   :  { %909 = vmatprep.mubr.bf16.mxu0 %v4240_v59  ;;  %2409 = vmatprep.mubr.msk.bf16.mxu1 %vm3130_vm0, %v4239_v61 }
 0x1cd   :  { %1264 = vperm.xlu1 %2714, %v1262_v50  }
 0x1ce   :  { %880 = vmatpush1.bf16.msra.mxu0 %v3292_v5  ;;  %2396 = vmatpush3.bf16.msra.mxu1 %v3313_v12 }
 0x1cf   :  { %881 = vmatprep.subr.bf16.mxu0 %v3295_v6  ;;  %2397 = vmatprep.subr.bf16.mxu1 %v4239_v61 }
 0x1d1   :  { %1660 = vperm.xlu1 %2714, %v1658_v1  }
 0x1d2   :  { %882 = vmatpush1.bf16.msra.mxu0 %v3298_v7  ;;  %2398 = vmatpush3.bf16.msra.mxu1 %v3319_v14 }
 0x1d3   :  { %883 = vmatprep.subr.bf16.mxu0 %v3301_v8  ;;  %2399 = vmatprep.subr.bf16.mxu1 %v4239_v61 }
 0x1d5   :  { %2056 = vperm.xlu1 %2714, %v2054_v58  }
 0x1d6   :  { %884 = vmatpush1.bf16.msra.mxu0 %v3306_v10  ;;  %2400 = vmatpush3.bf16.msra.mxu1 %v3329_v17 }
 0x1d7   :  { %885 = vmatprep.subr.bf16.mxu0 %v3310_v11  ;;  %2401 = vmatprep.subr.bf16.mxu1 %v4239_v61 }
 0x1da   :  { %886 = vmatpush1.bf16.msra.mxu0 %v3315_v13  ;;  %2402 = vmatpush3.bf16.msra.mxu1 %v3339_v20 }
 0x1db   :  { %887 = vmatprep.subr.bf16.mxu0 %v3322_v15  ;;  %2403 = vmatprep.subr.bf16.mxu1 %v4239_v61 }
 0x1de   :  { %888 = vmatpush1.bf16.msra.mxu0 %v3326_v16  ;;  %2404 = vmatpush3.bf16.msra.mxu1 %v3349_v24 }
 0x1df   :  { %889 = vmatprep.subr.bf16.mxu0 %v3332_v18  ;;  %2405 = vmatprep.subr.bf16.mxu1 %v4239_v61 }
 0x1e2   :  { %890 = vmatpush1.bf16.msra.mxu0 %v3335_v19  ;;  %2406 = vmatpush3.bf16.msra.mxu1 %v3359_v28 }
 0x1e3   :  { %891 = vmatprep.subr.bf16.mxu0 %v3342_v21  ;;  %2407 = vmatprep.subr.bf16.mxu1 %v4239_v61 }
 0x1e6   :  { %892 = vmatpush1.bf16.msra.mxu0 %v3345_v22  ;;  %2408 = vmatpush3.bf16.msra.mxu1 %v3369_v31 }
 0x1e7   :  { %959 = vmatprep.subr.bf16.mxu0 %v3352_v25  ;;  %2413 = vmatprep.subr.bf16.mxu1 %v4239_v61 }
 0x1e9   :  { %910 = vmatmul.mubr.bf16.vlgmr.msra.gmra.mrb[8].mxu0 %v876_v62  ;;  %2410 = vmatmul.mubr.bf16.vlgmr.msra.gmra.mrb[16].mxu1 %v876_v62 }
 0x1ea   :  { %960 = vmatpush1.bf16.msra.mxu0 %v3356_v27  ;;  %2414 = vmatpush3.bf16.msra.mxu1 %v3382_v35 }
 0x1eb   :  { %961 = vmatprep.subr.bf16.mxu0 %v3362_v29  ;;  %2415 = vmatprep.subr.bf16.mxu1 %v4239_v61 }
 0x1ec   :  { %991 = vmatprep.mubr.bf16.mxu0 %v4240_v59  ;;  %2429 = vmatprep.mubr.msk.bf16.mxu1 %vm3130_vm0, %v4239_v61 }
 0x1ee   :  { %962 = vmatpush1.bf16.msra.mxu0 %v3365_v30  ;;  %2416 = vmatpush3.bf16.msra.mxu1 %v3396_v40 }
 0x1ef   :  { %963 = vmatprep.subr.bf16.mxu0 %v3372_v32  ;;  %2417 = vmatprep.subr.bf16.mxu1 %v4239_v61 }
 0x1f2   :  { %964 = vmatpush1.bf16.msra.mxu0 %v3379_v34  ;;  %2418 = vmatpush3.bf16.msra.mxu1 %v3410_v44 }
 0x1f3   :  { %965 = vmatprep.subr.bf16.mxu0 %v3387_v36  ;;  %2419 = vmatprep.subr.bf16.mxu1 %v4239_v61 }
 0x1f6   :  { %966 = vmatpush1.bf16.msra.mxu0 %v3393_v39  ;;  %2420 = vmatpush3.bf16.msra.mxu1 %v3422_v48 }
 0x1f7   :  { %967 = vmatprep.subr.bf16.mxu0 %v3400_v41  ;;  %2421 = vmatprep.subr.bf16.mxu1 %v4239_v61 }
 0x1fa   :  { %968 = vmatpush1.bf16.msra.mxu0 %v3407_v43  ;;  %2422 = vmatpush3.bf16.msra.mxu1 %v3432_v51 }
 0x1fb   :  { %969 = vmatprep.subr.bf16.mxu0 %v3414_v45  ;;  %2423 = vmatprep.subr.bf16.mxu1 %v4239_v61 }
 0x1fe   :  { %970 = vmatpush1.bf16.msra.mxu0 %v3419_v47  ;;  %2424 = vmatpush3.bf16.msra.mxu1 %v4241_v63 }
 0x1ff   :  { %971 = vmatprep.subr.bf16.mxu0 %v4242_v49  ;;  %2425 = vmatprep.subr.bf16.mxu1 %v4239_v61 }
 0x202   :  { %972 = vmatpush1.bf16.msra.mxu0 %v4243_v23  ;;  %2426 = vmatpush3.bf16.msra.mxu1 %v4244_v55 }
 0x203   :  { %973 = vmatprep.subr.bf16.mxu0 %v4245_v57  ;;  %2427 = vmatprep.subr.bf16.mxu1 %v4239_v61 }
 0x206   :  { %974 = vmatpush1.bf16.msra.mxu0 %v4246_v26  ;;  %2428 = vmatpush3.bf16.msra.mxu1 %v4247_v38 }
 0x207   :  { %1075 = vmatprep.subr.bf16.mxu0 %v4248_v37  ;;  %2433 = vmatprep.subr.bf16.mxu1 %v4239_v61 }
 0x29c   :  { %v795_v0 = vpop.f32.mrb[4].mxu0  ;;  %v836_v52 = vpop.f32.mrb[12].mxu1 }
 0x29d   :  { %v2638_v62 = vadd.f32 %v3532_v53, %v795_v0  ;;  %v797_v37 = vpop.f32.mrb[5].mxu0  ;;  %v2391_v38 = vpop.f32.mrb[13].mxu1  ;;  %v837_v47 = vadd.f32 %v836_v52, %v3538_v33 }
 0x29e   :  { %v799_v46 = vpop.f32.mrb[6].mxu0  ;;  %v839_v26 = vpop.f32.mrb[14].mxu1  ;;  %v2640_v50 = vadd.f32 %v3534_v2, %v797_v37  ;;  %v755_v38 = vadd.f32 %v3586_v54, %v3540_v60 }
 0x29f   :  { %v2148_v57 = vmul.f32 -1.442695, %v2638_v62  ;;  %v800_v55 = vpop.f32.mrb[7].mxu0  ;;  %v2392_v23 = vpop.f32.mrb[15].mxu1 }
 0x2a0   :  { %v2149_v49 = vmul.f32 -1.442695, %v2640_v50  ;;  %v869_v46 = vpop.permute.xlu0 %868 }
 0x2a1   :  { %2789 = vpow2.f32 %v2148_v57  ;;  %vm870_vm10 = vcmp.eq.s32.totalorder %v869_v46, 1 }
 0x2a2   :  { %2791 = vpow2.f32 %v2149_v49 }
 0x2ab   :  { %v2790_v42 = vpop.eup %2789 }
 0x2ac   :  { %v846_v1 = vadd.f32 1.0, %v2790_v42  ;;  %v2792_v58 = vpop.eup %2791 }
 0x2ad   :  { %v853_v63 = vadd.f32 1.0, %v2792_v58 }
 0x2ae   :  { %2793 = vrcp.f32 %v846_v1 }
 0x2af   :  { %2795 = vrcp.f32 %v853_v63 }
 0x2b8   :  { %v2794_v0 = vpop.eup %2793 }
 0x2b9   :  { %v856_v26 = vmul.f32 %v2794_v0, %v837_v47  ;;  %v2796_v23 = vpop.eup %2795 }
 0x2ba   :  { %v859_v62 = vsub.f32 1.0, %v2796_v23  ;;  %v861_v49 = vmul.f32 %v2796_v23, %v3546_v56 }
 0x2bb   :  { %v857_v55 = vadd.f32 %v856_v26, %v755_v38 }
 0x2bd   :  { %2797 = vtanh.f32 %v857_v55 }
 0x2c7   :  { %v2798_v57 = vpop.eup %2797 }
 0x2c8   :  { %v860_v37 = vmul.f32 %v2798_v57, %v859_v62 }
 0x2ca   :  { %v862_v50 = vadd.f32 %v861_v49, %v860_v37 }
 0x2cc   :  { %v3638_v42 = vsel %vm870_vm10, %v862_v50, %v3546_v56 }
 0x2cd   :  { %873 = vst [vmem:[#allocation14 + $0x8] sm:$0xff] %v3638_v42  ;;  %v958_v47 = vpack.c.bf16 %v3638_v42, %v3638_v42 }
 0x2cf   :  { %992 = vmatmul.mubr.bf16.vlgmr.msra.gmra.mrb[8].mxu0 %v958_v47  ;;  %2430 = vmatmul.mubr.bf16.vlgmr.msra.gmra.mrb[20].mxu1 %v958_v47 }
 0x2d0   :  { %1076 = vmatpush1.bf16.msra.mxu0 %v3286_v3  ;;  %2434 = vmatpush3.bf16.msra.mxu1 %v3303_v9  ;;  %v3678_v3 = vpop.f32.mrb[16].mxu1  ;;  %v4250_v9 = vld [vmem:[#allocation25_spill] sm:$0xff] }
 0x2d1   :  { %1077 = vmatprep.subr.bf16.mxu0 %v3289_v4  ;;  %2435 = vmatprep.subr.bf16.mxu1 %v4239_v61  ;;  %v2411_v4 = vpop.f32.mrb[17].mxu1  ;;  %v953_v37 = vadd.f32 %v3678_v3, %v3540_v60 }
 0x2d2   :  { %1107 = vmatprep.mubr.bf16.mxu0 %v4240_v59  ;;  %2449 = vmatprep.mubr.msk.bf16.mxu1 %vm3130_vm0, %v4239_v61 }
 0x2d4   :  { %1078 = vmatpush1.bf16.msra.mxu0 %v3292_v5  ;;  %2436 = vmatpush3.bf16.msra.mxu1 %v3313_v12  ;;  %v955_v5 = vpop.f32.mrb[18].mxu1  ;;  %v4253_v12 = vld [vmem:[#allocation27_spill] sm:$0xff] }
 0x2d5   :  { %1079 = vmatprep.subr.bf16.mxu0 %v3295_v6  ;;  %2437 = vmatprep.subr.bf16.mxu1 %v4239_v61  ;;  %v2412_v6 = vpop.f32.mrb[19].mxu1  ;;  %v1067_v5 = vpop.permute.xlu1 %1066 }
 0x2d6   :  { %vm1068_vm11 = vcmp.eq.s32.totalorder %v1067_v5, 1 }
 0x2d8   :  { %1080 = vmatpush1.bf16.msra.mxu0 %v3298_v7  ;;  %2438 = vmatpush3.bf16.msra.mxu1 %v3319_v14  ;;  %v1073_v7 = vld [vmem:[#allocation7 + $0x18] sm:$0xff] }
 0x2d9   :  { %1081 = vmatprep.subr.bf16.mxu0 %v3301_v8  ;;  %2439 = vmatprep.subr.bf16.mxu1 %v4239_v61  ;;  %v1074_v8 = vpack.c.bf16 %v1073_v7, %v1073_v7  ;;  %v4255_v14 = vld [vmem:[#allocation28_spill] sm:$0xff] }
 0x2dc   :  { %1082 = vmatpush1.bf16.msra.mxu0 %v3306_v10  ;;  %2440 = vmatpush3.bf16.msra.mxu1 %v3329_v17  ;;  %v4251_v10 = vld [vmem:[#allocation30_spill] sm:$0xff]  ;;  %v3713_v17 = vld [vmem:[#allocation8 + $0x4] ss:$12 sps:$4 sm:$0xff]  }
 0x2dd   :  { %1083 = vmatprep.subr.bf16.mxu0 %v3310_v11  ;;  %2441 = vmatprep.subr.bf16.mxu1 %v4239_v61  ;;  %v4252_v11 = vld [vmem:[#allocation26_spill] sm:$0xff]  ;;  %4258 = vst [vmem:[#allocation23_spill] sm:$0xff] %v3713_v17 }
 0x2e0   :  { %1084 = vmatpush1.bf16.msra.mxu0 %v3315_v13  ;;  %2442 = vmatpush3.bf16.msra.mxu1 %v3339_v20  ;;  %v4254_v13 = vld [vmem:[#allocation31_spill] sm:$0xff] }
 0x2e1   :  { %1085 = vmatprep.subr.bf16.mxu0 %v3322_v15  ;;  %2443 = vmatprep.subr.bf16.mxu1 %v4239_v61  ;;  %v4256_v15 = vld [vmem:[#allocation29_spill] sm:$0xff] }
 0x2e4   :  { %1086 = vmatpush1.bf16.msra.mxu0 %v3326_v16  ;;  %2444 = vmatpush3.bf16.msra.mxu1 %v3349_v24  ;;  %v4257_v16 = vld [vmem:[#allocation32_spill] sm:$0xff] }
 0x2e5   :  { %1087 = vmatprep.subr.bf16.mxu0 %v3332_v18  ;;  %2445 = vmatprep.subr.bf16.mxu1 %v4239_v61 }
 0x2e8   :  { %1088 = vmatpush1.bf16.msra.mxu0 %v3335_v19  ;;  %2446 = vmatpush3.bf16.msra.mxu1 %v3359_v28 }
 0x2e9   :  { %1089 = vmatprep.subr.bf16.mxu0 %v3342_v21  ;;  %2447 = vmatprep.subr.bf16.mxu1 %v4239_v61 }
 0x2ec   :  { %1090 = vmatpush1.bf16.msra.mxu0 %v3345_v22  ;;  %2448 = vmatpush3.bf16.msra.mxu1 %v3369_v31 }
 0x2ed   :  { %1157 = vmatprep.subr.bf16.mxu0 %v3352_v25  ;;  %2453 = vmatprep.subr.bf16.mxu1 %v4239_v61 }
 0x2ef   :  { %1108 = vmatmul.mubr.bf16.vlgmr.msra.gmra.mrb[12].mxu0 %v1074_v8  ;;  %2450 = vmatmul.mubr.bf16.vlgmr.msra.gmra.mrb[24].mxu1 %v1074_v8 }
 0x2f0   :  { %1158 = vmatpush1.bf16.msra.mxu0 %v3356_v27  ;;  %2454 = vmatpush3.bf16.msra.mxu1 %v3382_v35 }
 0x2f1   :  { %1159 = vmatprep.subr.bf16.mxu0 %v3362_v29  ;;  %2455 = vmatprep.subr.bf16.mxu1 %v4239_v61 }
 0x2f2   :  { %1189 = vmatprep.mubr.bf16.mxu0 %v4240_v59  ;;  %2469 = vmatprep.mubr.msk.bf16.mxu1 %vm3130_vm0, %v4239_v61 }
 0x2f4   :  { %1160 = vmatpush1.bf16.msra.mxu0 %v3365_v30  ;;  %2456 = vmatpush3.bf16.msra.mxu1 %v3396_v40 }
 0x2f5   :  { %1161 = vmatprep.subr.bf16.mxu0 %v3372_v32  ;;  %2457 = vmatprep.subr.bf16.mxu1 %v4239_v61 }
 0x2f8   :  { %1162 = vmatpush1.bf16.msra.mxu0 %v3379_v34  ;;  %2458 = vmatpush3.bf16.msra.mxu1 %v3410_v44 }
 0x2f9   :  { %1163 = vmatprep.subr.bf16.mxu0 %v3387_v36  ;;  %2459 = vmatprep.subr.bf16.mxu1 %v4239_v61 }
 0x2fc   :  { %1164 = vmatpush1.bf16.msra.mxu0 %v3393_v39  ;;  %2460 = vmatpush3.bf16.msra.mxu1 %v3422_v48 }
 0x2fd   :  { %1165 = vmatprep.subr.bf16.mxu0 %v3400_v41  ;;  %2461 = vmatprep.subr.bf16.mxu1 %v4239_v61 }
 0x300   :  { %1166 = vmatpush1.bf16.msra.mxu0 %v3407_v43  ;;  %2462 = vmatpush3.bf16.msra.mxu1 %v3432_v51 }
 0x301   :  { %1167 = vmatprep.subr.bf16.mxu0 %v3414_v45  ;;  %2463 = vmatprep.subr.bf16.mxu1 %v4239_v61 }
 0x304   :  { %1168 = vmatpush1.bf16.msra.mxu0 %v4250_v9  ;;  %2464 = vmatpush3.bf16.msra.mxu1 %v4251_v10 }
 0x305   :  { %1169 = vmatprep.subr.bf16.mxu0 %v4252_v11  ;;  %2465 = vmatprep.subr.bf16.mxu1 %v4239_v61 }
 0x308   :  { %1170 = vmatpush1.bf16.msra.mxu0 %v4253_v12  ;;  %2466 = vmatpush3.bf16.msra.mxu1 %v4254_v13 }
 0x309   :  { %1171 = vmatprep.subr.bf16.mxu0 %v4255_v14  ;;  %2467 = vmatprep.subr.bf16.mxu1 %v4239_v61 }
 0x30c   :  { %1172 = vmatpush1.bf16.msra.mxu0 %v4256_v15  ;;  %2468 = vmatpush3.bf16.msra.mxu1 %v4257_v16 }
 0x30d   :  { %1273 = vmatprep.subr.bf16.mxu0 %v3713_v17  ;;  %2473 = vmatprep.subr.bf16.mxu1 %v4239_v61 }
 0x3a2   :  { %v993_v18 = vpop.f32.mrb[8].mxu0  ;;  %v1034_v19 = vpop.f32.mrb[20].mxu1 }
 0x3a3   :  { %v2642_v20 = vadd.f32 %v3532_v53, %v993_v18  ;;  %v995_v21 = vpop.f32.mrb[9].mxu0  ;;  %v2431_v22 = vpop.f32.mrb[21].mxu1  ;;  %v1035_v62 = vadd.f32 %v1034_v19, %v3538_v33  ;;  %v3729_v19 = vld [vmem:[#allocation8] ss:$12 sps:$4 sm:$0xff]  }
 0x3a4   :  { %v997_v56 = vpop.f32.mrb[10].mxu0  ;;  %v1037_v54 = vpop.f32.mrb[22].mxu1  ;;  %v2644_v58 = vadd.f32 %v3534_v2, %v995_v21  ;;  %v3735_v21 = vld [vmem:[#allocation8 + $0x1c] ss:$12 sps:$4 sm:$0xff]   ;;  %v3745_v22 = vld [vmem:[#allocation8 + $0x20] ss:$12 sps:$4 sm:$0xff]  }
 0x3a5   :  { %v2151_v63 = vmul.f32 -1.442695, %v2642_v20  ;;  %v998_v52 = vpop.f32.mrb[11].mxu0  ;;  %v2432_v1 = vpop.f32.mrb[23].mxu1  ;;  %v3732_v20 = vld [vmem:[#allocation8 + $0x8] ss:$12 sps:$4 sm:$0xff]  }
 0x3a6   :  { %v2152_v0 = vmul.f32 -1.442695, %v2644_v58  ;;  %v3748_v56 = vld [vmem:[#allocation8 + $0x34] ss:$12 sps:$4 sm:$0xff]   ;;  %v3752_v54 = vld [vmem:[#allocation8 + $0x30] ss:$12 sps:$4 sm:$0xff]  }
 0x3a7   :  { %2799 = vpow2.f32 %v2151_v63  ;;  %v3755_v63 = vld [vmem:[#allocation8 + $0x38] ss:$12 sps:$4 sm:$0xff]   ;;  %v3762_v1 = vld [vmem:[#allocation8 + $0x48] ss:$12 sps:$4 sm:$0xff]   ;;  %v3765_v58 = vld [vmem:[#allocation8 + $0x50] ss:$12 sps:$4 sm:$0xff]  }
 0x3a8   :  { %2801 = vpow2.f32 %v2152_v0  ;;  %v3758_v52 = vld [vmem:[#allocation8 + $0x4c] ss:$12 sps:$4 sm:$0xff]   ;;  %v3768_v0 = vld [vmem:[#allocation8 + $0x64] ss:$12 sps:$4 sm:$0xff]  }
 0x3b1   :  { %v2800_v38 = vpop.eup %2799 }
 0x3b2   :  { %v1044_v26 = vadd.f32 1.0, %v2800_v38  ;;  %v2802_v55 = vpop.eup %2801  ;;  %v3772_v38 = vld [vmem:[#allocation8 + $0x60] ss:$12 sps:$4 sm:$0xff]  }
 0x3b3   :  { %v1051_v23 = vadd.f32 1.0, %v2802_v55  ;;  %v3778_v55 = vld [vmem:[#allocation8 + $0x7c] ss:$12 sps:$4 sm:$0xff]  }
 0x3b4   :  { %2803 = vrcp.f32 %v1044_v26  ;;  %v3775_v26 = vld [vmem:[#allocation8 + $0x68] ss:$12 sps:$4 sm:$0xff]  }
 0x3b5   :  { %2805 = vrcp.f32 %v1051_v23  ;;  %v3782_v23 = vld [vmem:[#allocation8 + $0x78] ss:$12 sps:$4 sm:$0xff]  }
 0x3be   :  { %v2804_v57 = vpop.eup %2803 }
 0x3bf   :  { %v1054_v49 = vmul.f32 %v2804_v57, %v1035_v62  ;;  %v2806_v50 = vpop.eup %2805  ;;  %v3786_v62 = vld [vmem:[#allocation8 + $0x94] ss:$12 sps:$4 sm:$0xff]   ;;  %v3790_v57 = vld [vmem:[#allocation8 + $0x90] ss:$12 sps:$4 sm:$0xff]  }
 0x3c0   :  { %v1057_v47 = vsub.f32 1.0, %v2806_v50  ;;  %v1059_v7 = vmul.f32 %v2806_v50, %v3638_v42 }
 0x3c1   :  { %v1055_v46 = vadd.f32 %v1054_v49, %v953_v37  ;;  %v3794_v37 = vld [vmem:[#allocation8 + $0xac] ss:$12 sps:$4 sm:$0xff]   ;;  %v3798_v49 = vld [vmem:[#allocation8 + $0xa8] ss:$12 sps:$4 sm:$0xff]  }
 0x3c3   :  { %2807 = vtanh.f32 %v1055_v46 }
 0x3cd   :  { %v2808_v4 = vpop.eup %2807 }
 0x3ce   :  { %v1058_v6 = vmul.f32 %v2808_v4, %v1057_v47  ;;  %v1271_v47 = vld [vmem:[#allocation7 + $0x20] sm:$0xff] }
 0x3cf   :  { %v1272_v4 = vpack.c.bf16 %v1271_v47, %v1271_v47 }
 0x3d0   :  { %v1060_v8 = vadd.f32 %v1059_v7, %v1058_v6  ;;  %v1265_v6 = vpop.permute.xlu1 %1264 }
 0x3d1   :  { %vm1266_vm12 = vcmp.eq.s32.totalorder %v1265_v6, 1 }
 0x3d2   :  { %v3724_v18 = vsel %vm1068_vm11, %v1060_v8, %v3638_v42  ;;  %v3742_v42 = vld [vmem:[#allocation8 + $0x18] ss:$12 sps:$4 sm:$0xff]  }
 0x3d3   :  { %1071 = vst [vmem:[#allocation14 + $0x10] sm:$0xff] %v3724_v18  ;;  %v1156_v3 = vpack.c.bf16 %v3724_v18, %v3724_v18 }
 0x3d5   :  { %1190 = vmatmul.mubr.bf16.vlgmr.msra.gmra.mrb[12].mxu0 %v1156_v3  ;;  %2470 = vmatmul.mubr.bf16.vlgmr.msra.gmra.mrb[28].mxu1 %v1156_v3 }
 0x3d6   :  { %1274 = vmatpush1.bf16.msra.mxu0 %v3729_v19  ;;  %2474 = vmatpush3.bf16.msra.mxu1 %v3732_v20 }
 0x3d7   :  { %1275 = vmatprep.subr.bf16.mxu0 %v3735_v21  ;;  %2475 = vmatprep.subr.bf16.mxu1 %v4239_v61 }
 0x3d8   :  { %1305 = vmatprep.mubr.bf16.mxu0 %v4240_v59  ;;  %2489 = vmatprep.mubr.msk.bf16.mxu1 %vm3130_vm0, %v4239_v61 }
 0x3da   :  { %1276 = vmatpush1.bf16.msra.mxu0 %v3742_v42  ;;  %2476 = vmatpush3.bf16.msra.mxu1 %v3745_v22 }
 0x3db   :  { %1277 = vmatprep.subr.bf16.mxu0 %v3748_v56  ;;  %2477 = vmatprep.subr.bf16.mxu1 %v4239_v61 }
 0x3de   :  { %1278 = vmatpush1.bf16.msra.mxu0 %v3752_v54  ;;  %2478 = vmatpush3.bf16.msra.mxu1 %v3755_v63 }
 0x3df   :  { %1279 = vmatprep.subr.bf16.mxu0 %v3758_v52  ;;  %2479 = vmatprep.subr.bf16.mxu1 %v4239_v61 }
 0x3e2   :  { %1280 = vmatpush1.bf16.msra.mxu0 %v3762_v1  ;;  %2480 = vmatpush3.bf16.msra.mxu1 %v3765_v58 }
 0x3e3   :  { %1281 = vmatprep.subr.bf16.mxu0 %v3768_v0  ;;  %2481 = vmatprep.subr.bf16.mxu1 %v4239_v61 }
 0x3e6   :  { %1282 = vmatpush1.bf16.msra.mxu0 %v3772_v38  ;;  %2482 = vmatpush3.bf16.msra.mxu1 %v3775_v26 }
 0x3e7   :  { %1283 = vmatprep.subr.bf16.mxu0 %v3778_v55  ;;  %2483 = vmatprep.subr.bf16.mxu1 %v4239_v61 }
 0x3ea   :  { %1284 = vmatpush1.bf16.msra.mxu0 %v3782_v23  ;;  %2484 = vmatpush3.bf16.msra.mxu1 %v3349_v24  ;;  %v3804_v24 = vpop.f32.mrb[24].mxu1 }
 0x3eb   :  { %1285 = vmatprep.subr.bf16.mxu0 %v3786_v62  ;;  %2485 = vmatprep.subr.bf16.mxu1 %v4239_v61  ;;  %v2451_v46 = vpop.f32.mrb[25].mxu1 }
 0x3ec   :  { %v3889_v46 = vld [vmem:[#allocation8 + $0xb0] ss:$12 sps:$4 sm:$0xff]  }
 0x3ee   :  { %1286 = vmatpush1.bf16.msra.mxu0 %v3790_v57  ;;  %2486 = vmatpush3.bf16.msra.mxu1 %v3359_v28  ;;  %v1153_v28 = vpop.f32.mrb[26].mxu1 }
 0x3ef   :  { %1287 = vmatprep.subr.bf16.mxu0 %v3794_v37  ;;  %2487 = vmatprep.subr.bf16.mxu1 %v4239_v61  ;;  %v2452_v50 = vpop.f32.mrb[27].mxu1  ;;  %v3892_v28 = vld [vmem:[#allocation10 + $0x4] ss:$12 sps:$4 sm:$0xff]  }
 0x3f2   :  { %1288 = vmatpush1.bf16.msra.mxu0 %v3798_v49  ;;  %2488 = vmatpush3.bf16.msra.mxu1 %v3369_v31 }
 0x3f3   :  { %1355 = vmatprep.subr.bf16.mxu0 %v3352_v25  ;;  %2493 = vmatprep.subr.bf16.mxu1 %v4239_v61 }
 0x3f5   :  { %1306 = vmatmul.mubr.bf16.vlgmr.msra.gmra.mrb[16].mxu0 %v1272_v4  ;;  %2490 = vmatmul.mubr.bf16.vlgmr.msra.gmra.mrb[32].mxu1 %v1272_v4 }
 0x3f6   :  { %1356 = vmatpush1.bf16.msra.mxu0 %v3356_v27  ;;  %2494 = vmatpush3.bf16.msra.mxu1 %v3382_v35 }
 0x3f7   :  { %1357 = vmatprep.subr.bf16.mxu0 %v3362_v29  ;;  %2495 = vmatprep.subr.bf16.mxu1 %v4239_v61 }
 0x3f8   :  { %1387 = vmatprep.mubr.bf16.mxu0 %v4240_v59  ;;  %2509 = vmatprep.mubr.msk.bf16.mxu1 %vm3130_vm0, %v4239_v61 }
 0x3fa   :  { %1358 = vmatpush1.bf16.msra.mxu0 %v3365_v30  ;;  %2496 = vmatpush3.bf16.msra.mxu1 %v3396_v40 }
 0x3fb   :  { %1359 = vmatprep.subr.bf16.mxu0 %v3372_v32  ;;  %2497 = vmatprep.subr.bf16.mxu1 %v4239_v61 }
 0x3fe   :  { %1360 = vmatpush1.bf16.msra.mxu0 %v3379_v34  ;;  %2498 = vmatpush3.bf16.msra.mxu1 %v3410_v44 }
 0x3ff   :  { %1361 = vmatprep.subr.bf16.mxu0 %v3387_v36  ;;  %2499 = vmatprep.subr.bf16.mxu1 %v4239_v61 }
 0x402   :  { %1362 = vmatpush1.bf16.msra.mxu0 %v3393_v39  ;;  %2500 = vmatpush3.bf16.msra.mxu1 %v3422_v48 }
 0x403   :  { %1363 = vmatprep.subr.bf16.mxu0 %v3400_v41  ;;  %2501 = vmatprep.subr.bf16.mxu1 %v4239_v61 }
 0x406   :  { %1364 = vmatpush1.bf16.msra.mxu0 %v3407_v43  ;;  %2502 = vmatpush3.bf16.msra.mxu1 %v3432_v51 }
 0x407   :  { %1365 = vmatprep.subr.bf16.mxu0 %v3414_v45  ;;  %2503 = vmatprep.subr.bf16.mxu1 %v4239_v61 }
 0x40a   :  { %1366 = vmatpush1.bf16.msra.mxu0 %v4250_v9  ;;  %2504 = vmatpush3.bf16.msra.mxu1 %v4251_v10  ;;  %v1151_v10 = vadd.f32 %v3804_v24, %v3540_v60  ;;  %v3883_v24 = vld [vmem:[#allocation8 + $0x98] ss:$12 sps:$4 sm:$0xff]  }
 0x40b   :  { %1367 = vmatprep.subr.bf16.mxu0 %v4252_v11  ;;  %2505 = vmatprep.subr.bf16.mxu1 %v4239_v61 }
 0x40e   :  { %1368 = vmatpush1.bf16.msra.mxu0 %v4253_v12  ;;  %2506 = vmatpush3.bf16.msra.mxu1 %v4254_v13 }
 0x40f   :  { %1369 = vmatprep.subr.bf16.mxu0 %v4255_v14  ;;  %2507 = vmatprep.subr.bf16.mxu1 %v4239_v61 }
 0x412   :  { %1370 = vmatpush1.bf16.msra.mxu0 %v4256_v15  ;;  %2508 = vmatpush3.bf16.msra.mxu1 %v4257_v16 }
 0x413   :  { %1471 = vmatprep.subr.bf16.mxu0 %v3713_v17  ;;  %2513 = vmatprep.subr.bf16.mxu1 %v4239_v61 }
 0x4a8   :  { %v1191_v25 = vpop.f32.mrb[12].mxu0  ;;  %v1232_v27 = vpop.f32.mrb[28].mxu1 }
 0x4a9   :  { %v2646_v29 = vadd.f32 %v3532_v53, %v1191_v25  ;;  %v1193_v30 = vpop.f32.mrb[13].mxu0  ;;  %v2471_v31 = vpop.f32.mrb[29].mxu1  ;;  %v1233_v51 = vadd.f32 %v1232_v27, %v3538_v33  ;;  %v1469_v27 = vld [vmem:[#allocation7 + $0x28] sm:$0xff] }
 0x4aa   :  { %v1195_v32 = vpop.f32.mrb[14].mxu0  ;;  %v1235_v34 = vpop.f32.mrb[30].mxu1  ;;  %v2648_v40 = vadd.f32 %v3534_v2, %v1193_v30  ;;  %v3898_v30 = vld [vmem:[#allocation10] ss:$12 sps:$4 sm:$0xff]   ;;  %v3901_v31 = vld [vmem:[#allocation10 + $0x8] ss:$12 sps:$4 sm:$0xff]  }
 0x4ab   :  { %v2154_v35 = vmul.f32 -1.442695, %v2646_v29  ;;  %v1196_v36 = vpop.f32.mrb[15].mxu0  ;;  %v2472_v39 = vpop.f32.mrb[31].mxu1  ;;  %v1470_v29 = vpack.c.bf16 %v1469_v27, %v1469_v27  ;;  %v3904_v32 = vld [vmem:[#allocation10 + $0x1c] ss:$12 sps:$4 sm:$0xff]  }
 0x4ac   :  { %v2155_v41 = vmul.f32 -1.442695, %v2648_v40  ;;  %v3911_v34 = vld [vmem:[#allocation10 + $0x18] ss:$12 sps:$4 sm:$0xff]   ;;  %v3917_v36 = vld [vmem:[#allocation10 + $0x34] ss:$12 sps:$4 sm:$0xff]  }
 0x4ad   :  { %2809 = vpow2.f32 %v2154_v35  ;;  %v3914_v35 = vld [vmem:[#allocation10 + $0x20] ss:$12 sps:$4 sm:$0xff]   ;;  %v3921_v39 = vld [vmem:[#allocation10 + $0x30] ss:$12 sps:$4 sm:$0xff]   ;;  %v3924_v40 = vld [vmem:[#allocation10 + $0x38] ss:$12 sps:$4 sm:$0xff]  }
 0x4ae   :  { %2811 = vpow2.f32 %v2155_v41  ;;  %v3927_v41 = vld [vmem:[#allocation10 + $0x4c] ss:$12 sps:$4 sm:$0xff]  }
 0x4b7   :  { %v2810_v43 = vpop.eup %2809 }
 0x4b8   :  { %v1242_v44 = vadd.f32 1.0, %v2810_v43  ;;  %v2812_v45 = vpop.eup %2811  ;;  %v3931_v43 = vld [vmem:[#allocation10 + $0x48] ss:$12 sps:$4 sm:$0xff]  }
 0x4b9   :  { %v1249_v48 = vadd.f32 1.0, %v2812_v45  ;;  %v3937_v45 = vld [vmem:[#allocation10 + $0x64] ss:$12 sps:$4 sm:$0xff]  }
 0x4ba   :  { %2813 = vrcp.f32 %v1242_v44  ;;  %v3934_v44 = vld [vmem:[#allocation10 + $0x50] ss:$12 sps:$4 sm:$0xff]  }
 0x4bb   :  { %2815 = vrcp.f32 %v1249_v48  ;;  %v3941_v48 = vld [vmem:[#allocation10 + $0x60] ss:$12 sps:$4 sm:$0xff]  }
 0x4c4   :  { %v2814_v9 = vpop.eup %2813 }
 0x4c5   :  { %v1252_v11 = vmul.f32 %v2814_v9, %v1233_v51  ;;  %v2816_v13 = vpop.eup %2815  ;;  %v3944_v51 = vld [vmem:[#allocation10 + $0x68] ss:$12 sps:$4 sm:$0xff]  }
 0x4c6   :  { %v1255_v14 = vsub.f32 1.0, %v2816_v13  ;;  %v1257_v5 = vmul.f32 %v2816_v13, %v3724_v18  ;;  %v3947_v9 = vld [vmem:[#allocation10 + $0x7c] ss:$12 sps:$4 sm:$0xff]  }
 0x4c7   :  { %v1253_v12 = vadd.f32 %v1252_v11, %v1151_v10  ;;  %v3951_v10 = vld [vmem:[#allocation10 + $0x78] ss:$12 sps:$4 sm:$0xff]   ;;  %v3954_v11 = vld [vmem:[#allocation10 + $0x80] ss:$12 sps:$4 sm:$0xff]   ;;  %v3961_v13 = vld [vmem:[#allocation10 + $0x90] ss:$12 sps:$4 sm:$0xff]  }
 0x4c8   :  { %v3896_v50 = vpop.f32.mrb[32].mxu1  ;;  %4259 = vst [vmem:[#allocation24_spill] sm:$0xff] %v3951_v10  ;;  %4260 = vst [vmem:[#allocation25_spill] sm:$0xff] %v3954_v11 }
 0x4c9   :  { %2817 = vtanh.f32 %v1253_v12  ;;  %v2491_v47 = vpop.f32.mrb[33].mxu1  ;;  %v3957_v12 = vld [vmem:[#allocation10 + $0x94] ss:$12 sps:$4 sm:$0xff]   ;;  %4262 = vst [vmem:[#allocation26_spill] sm:$0xff] %v3961_v13 }
 0x4ca   :  { %v1351_v4 = vpop.f32.mrb[34].mxu1  ;;  %4261 = vst [vmem:[#allocation30_spill] sm:$0xff] %v3957_v12 }
 0x4cb   :  { %v2492_v25 = vpop.f32.mrb[35].mxu1 }
 0x4d3   :  { %v2818_v15 = vpop.eup %2817 }
 0x4d4   :  { %v1256_v16 = vmul.f32 %v2818_v15, %v1255_v14  ;;  %v3964_v14 = vld [vmem:[#allocation10 + $0x98] ss:$12 sps:$4 sm:$0xff]  }
 0x4d5   :  { %4263 = vst [vmem:[#allocation27_spill] sm:$0xff] %v3964_v14  ;;  %v3967_v15 = vld [vmem:[#allocation10 + $0xac] ss:$12 sps:$4 sm:$0xff]  }
 0x4d6   :  { %v1258_v7 = vadd.f32 %v1257_v5, %v1256_v16  ;;  %4264 = vst [vmem:[#allocation31_spill] sm:$0xff] %v3967_v15  ;;  %v3971_v16 = vld [vmem:[#allocation10 + $0xa8] ss:$12 sps:$4 sm:$0xff]   ;;  %v3974_v5 = vld [vmem:[#allocation10 + $0xb0] ss:$12 sps:$4 sm:$0xff]  }
 0x4d7   :  { %4265 = vst [vmem:[#allocation28_spill] sm:$0xff] %v3971_v16  ;;  %4266 = vst [vmem:[#allocation29_spill] sm:$0xff] %v3974_v5 }
 0x4d8   :  { %v3848_v8 = vsel %vm1266_vm12, %v1258_v7, %v3724_v18  ;;  %v3877_v18 = vld [vmem:[#allocation8 + $0x80] ss:$12 sps:$4 sm:$0xff]  }
 0x4d9   :  { %1269 = vst [vmem:[#allocation14 + $0x18] sm:$0xff] %v3848_v8  ;;  %v1354_v3 = vpack.c.bf16 %v3848_v8, %v3848_v8 }
 0x4db   :  { %1388 = vmatmul.mubr.bf16.vlgmr.msra.gmra.mrb[16].mxu0 %v1354_v3  ;;  %2510 = vmatmul.mubr.bf16.vlgmr.msra.gmra.mrb[36].mxu1 %v1354_v3 }
 0x4dc   :  { %1472 = vmatpush1.bf16.msra.mxu0 %v3729_v19  ;;  %2514 = vmatpush3.bf16.msra.mxu1 %v3732_v20 }
 0x4dd   :  { %1473 = vmatprep.subr.bf16.mxu0 %v3735_v21  ;;  %2515 = vmatprep.subr.bf16.mxu1 %v4239_v61 }
 0x4de   :  { %1503 = vmatprep.mubr.bf16.mxu0 %v4240_v59  ;;  %2529 = vmatprep.mubr.msk.bf16.mxu1 %vm3130_vm0, %v4239_v61 }
 0x4e0   :  { %1474 = vmatpush1.bf16.msra.mxu0 %v3742_v42  ;;  %2516 = vmatpush3.bf16.msra.mxu1 %v3745_v22 }
 0x4e1   :  { %1475 = vmatprep.subr.bf16.mxu0 %v3748_v56  ;;  %2517 = vmatprep.subr.bf16.mxu1 %v4239_v61 }
 0x4e4   :  { %1476 = vmatpush1.bf16.msra.mxu0 %v3752_v54  ;;  %2518 = vmatpush3.bf16.msra.mxu1 %v3755_v63 }
 0x4e5   :  { %1477 = vmatprep.subr.bf16.mxu0 %v3758_v52  ;;  %2519 = vmatprep.subr.bf16.mxu1 %v4239_v61 }
 0x4e8   :  { %1478 = vmatpush1.bf16.msra.mxu0 %v3762_v1  ;;  %2520 = vmatpush3.bf16.msra.mxu1 %v3765_v58 }
 0x4e9   :  { %1479 = vmatprep.subr.bf16.mxu0 %v3768_v0  ;;  %2521 = vmatprep.subr.bf16.mxu1 %v4239_v61 }
 0x4ec   :  { %1480 = vmatpush1.bf16.msra.mxu0 %v3772_v38  ;;  %2522 = vmatpush3.bf16.msra.mxu1 %v3775_v26 }
 0x4ed   :  { %1481 = vmatprep.subr.bf16.mxu0 %v3778_v55  ;;  %2523 = vmatprep.subr.bf16.mxu1 %v4239_v61 }
 0x4f0   :  { %1482 = vmatpush1.bf16.msra.mxu0 %v3782_v23  ;;  %2524 = vmatpush3.bf16.msra.mxu1 %v3877_v18 }
 0x4f1   :  { %1483 = vmatprep.subr.bf16.mxu0 %v3786_v62  ;;  %2525 = vmatprep.subr.bf16.mxu1 %v4239_v61 }
 0x4f4   :  { %1484 = vmatpush1.bf16.msra.mxu0 %v3790_v57  ;;  %2526 = vmatpush3.bf16.msra.mxu1 %v3883_v24 }
 0x4f5   :  { %1485 = vmatprep.subr.bf16.mxu0 %v3794_v37  ;;  %2527 = vmatprep.subr.bf16.mxu1 %v4239_v61 }
 0x4f8   :  { %1486 = vmatpush1.bf16.msra.mxu0 %v3798_v49  ;;  %2528 = vmatpush3.bf16.msra.mxu1 %v3889_v46 }
 0x4f9   :  { %1553 = vmatprep.subr.bf16.mxu0 %v3892_v28  ;;  %2533 = vmatprep.subr.bf16.mxu1 %v4239_v61 }
 0x4fb   :  { %1504 = vmatmul.mubr.bf16.vlgmr.msra.gmra.mrb[20].mxu0 %v1470_v29  ;;  %2530 = vmatmul.mubr.bf16.vlgmr.msra.gmra.mrb[40].mxu1 %v1470_v29 }
 0x4fc   :  { %1554 = vmatpush1.bf16.msra.mxu0 %v3898_v30  ;;  %2534 = vmatpush3.bf16.msra.mxu1 %v3901_v31 }
 0x4fd   :  { %1555 = vmatprep.subr.bf16.mxu0 %v3904_v32  ;;  %2535 = vmatprep.subr.bf16.mxu1 %v4239_v61 }
 0x4fe   :  { %1585 = vmatprep.mubr.bf16.mxu0 %v4240_v59  ;;  %2549 = vmatprep.mubr.msk.bf16.mxu1 %vm3130_vm0, %v4239_v61 }
 0x500   :  { %1556 = vmatpush1.bf16.msra.mxu0 %v3911_v34  ;;  %2536 = vmatpush3.bf16.msra.mxu1 %v3914_v35 }
 0x501   :  { %1557 = vmatprep.subr.bf16.mxu0 %v3917_v36  ;;  %2537 = vmatprep.subr.bf16.mxu1 %v4239_v61 }
 0x504   :  { %1558 = vmatpush1.bf16.msra.mxu0 %v3921_v39  ;;  %2538 = vmatpush3.bf16.msra.mxu1 %v3924_v40 }
 0x505   :  { %1559 = vmatprep.subr.bf16.mxu0 %v3927_v41  ;;  %2539 = vmatprep.subr.bf16.mxu1 %v4239_v61 }
 0x508   :  { %1560 = vmatpush1.bf16.msra.mxu0 %v3931_v43  ;;  %2540 = vmatpush3.bf16.msra.mxu1 %v3934_v44 }
 0x509   :  { %1561 = vmatprep.subr.bf16.mxu0 %v3937_v45  ;;  %2541 = vmatprep.subr.bf16.mxu1 %v4239_v61 }
 0x50c   :  { %1562 = vmatpush1.bf16.msra.mxu0 %v3941_v48  ;;  %2542 = vmatpush3.bf16.msra.mxu1 %v3944_v51 }
 0x50d   :  { %1563 = vmatprep.subr.bf16.mxu0 %v3947_v9  ;;  %2543 = vmatprep.subr.bf16.mxu1 %v4239_v61 }
 0x510   :  { %1564 = vmatpush1.bf16.msra.mxu0 %v3951_v10  ;;  %2544 = vmatpush3.bf16.msra.mxu1 %v3954_v11 }
 0x511   :  { %1565 = vmatprep.subr.bf16.mxu0 %v3957_v12  ;;  %2545 = vmatprep.subr.bf16.mxu1 %v4239_v61 }
 0x514   :  { %1566 = vmatpush1.bf16.msra.mxu0 %v3961_v13  ;;  %2546 = vmatpush3.bf16.msra.mxu1 %v3964_v14 }
 0x515   :  { %1567 = vmatprep.subr.bf16.mxu0 %v3967_v15  ;;  %2547 = vmatprep.subr.bf16.mxu1 %v4239_v61 }
 0x518   :  { %1568 = vmatpush1.bf16.msra.mxu0 %v3971_v16  ;;  %2548 = vmatpush3.bf16.msra.mxu1 %v3974_v5 }
 0x519   :  { %1669 = vmatprep.subr.bf16.mxu0 %v3713_v17  ;;  %2553 = vmatprep.subr.bf16.mxu1 %v4239_v61 }
 0x5ae   :  { %v1389_v6 = vpop.f32.mrb[16].mxu0  ;;  %v1430_v7 = vpop.f32.mrb[36].mxu1 }
 0x5af   :  { %v2650_v3 = vadd.f32 %v3532_v53, %v1389_v6  ;;  %v1391_v47 = vpop.f32.mrb[17].mxu0  ;;  %v2511_v4 = vpop.f32.mrb[37].mxu1  ;;  %v1431_v10 = vadd.f32 %v1430_v7, %v3538_v33 }
 0x5b0   :  { %v1393_v25 = vpop.f32.mrb[18].mxu0  ;;  %v1433_v27 = vpop.f32.mrb[38].mxu1  ;;  %v2652_v16 = vadd.f32 %v3534_v2, %v1391_v47  ;;  %v1349_v4 = vadd.f32 %v3896_v50, %v3540_v60 }
 0x5b1   :  { %v2157_v29 = vmul.f32 -1.442695, %v2650_v3  ;;  %v1394_v15 = vpop.f32.mrb[19].mxu0  ;;  %v2512_v14 = vpop.f32.mrb[39].mxu1  ;;  %v1667_v27 = vld [vmem:[#allocation7 + $0x30] sm:$0xff] }
 0x5b2   :  { %v2158_v13 = vmul.f32 -1.442695, %v2652_v16 }
 0x5b3   :  { %2819 = vpow2.f32 %v2157_v29  ;;  %v1668_v29 = vpack.c.bf16 %v1667_v27, %v1667_v27 }
 0x5b4   :  { %2821 = vpow2.f32 %v2158_v13 }
 0x5bd   :  { %v2820_v5 = vpop.eup %2819 }
 0x5be   :  { %v1440_v17 = vadd.f32 1.0, %v2820_v5  ;;  %v2822_v12 = vpop.eup %2821  ;;  %v1463_v5 = vpop.permute.xlu0 %1462 }
 0x5bf   :  { %v1447_v11 = vadd.f32 1.0, %v2822_v12  ;;  %vm1464_vm13 = vcmp.eq.s32.totalorder %v1463_v5, 1 }
 0x5c0   :  { %2823 = vrcp.f32 %v1440_v17 }
 0x5c1   :  { %2825 = vrcp.f32 %v1447_v11 }
 0x5ca   :  { %v2824_v6 = vpop.eup %2823 }
 0x5cb   :  { %v1450_v25 = vmul.f32 %v2824_v6, %v1431_v10  ;;  %v2826_v14 = vpop.eup %2825  ;;  %v4267_v6 = vld [vmem:[#allocation24_spill] sm:$0xff] }
 0x5cc   :  { %v1453_v3 = vsub.f32 1.0, %v2826_v14  ;;  %v1455_v13 = vmul.f32 %v2826_v14, %v3848_v8  ;;  %v4271_v14 = vld [vmem:[#allocation27_spill] sm:$0xff] }
 0x5cd   :  { %v1451_v15 = vadd.f32 %v1450_v25, %v1349_v4  ;;  %v4268_v4 = vld [vmem:[#allocation25_spill] sm:$0xff]  ;;  %v4269_v25 = vld [vmem:[#allocation30_spill] sm:$0xff] }
 0x5cf   :  { %2827 = vtanh.f32 %v1451_v15  ;;  %v4270_v15 = vld [vmem:[#allocation26_spill] sm:$0xff] }
 0x5d9   :  { %v2828_v47 = vpop.eup %2827 }
 0x5da   :  { %v1454_v16 = vmul.f32 %v2828_v47, %v1453_v3  ;;  %v4272_v3 = vld [vmem:[#allocation31_spill] sm:$0xff]  ;;  %v4273_v47 = vld [vmem:[#allocation28_spill] sm:$0xff] }
 0x5dc   :  { %v1456_v17 = vadd.f32 %v1455_v13, %v1454_v16  ;;  %v4274_v16 = vld [vmem:[#allocation29_spill] sm:$0xff]  ;;  %v4275_v13 = vld [vmem:[#allocation23_spill] sm:$0xff] }
 0x5de   :  { %v3986_v12 = vsel %vm1464_vm13, %v1456_v17, %v3848_v8  ;;  %v4026_v8 = vpop.f32.mrb[40].mxu1 }
 0x5df   :  { %1467 = vst [vmem:[#allocation14 + $0x20] sm:$0xff] %v3986_v12  ;;  %v1552_v50 = vpack.c.bf16 %v3986_v12, %v3986_v12  ;;  %v2531_v10 = vpop.f32.mrb[41].mxu1 }
 0x5e0   :  { %v1549_v11 = vpop.f32.mrb[42].mxu1 }
 0x5e1   :  { %1586 = vmatmul.mubr.bf16.vlgmr.msra.gmra.mrb[20].mxu0 %v1552_v50  ;;  %2550 = vmatmul.mubr.bf16.vlgmr.msra.gmra.mrb[44].mxu1 %v1552_v50  ;;  %v2532_v7 = vpop.f32.mrb[43].mxu1 }
 0x5e2   :  { %1670 = vmatpush1.bf16.msra.mxu0 %v3729_v19  ;;  %2554 = vmatpush3.bf16.msra.mxu1 %v3732_v20 }
 0x5e3   :  { %1671 = vmatprep.subr.bf16.mxu0 %v3735_v21  ;;  %2555 = vmatprep.subr.bf16.mxu1 %v4239_v61 }
 0x5e4   :  { %1701 = vmatprep.mubr.bf16.mxu0 %v4240_v59  ;;  %2569 = vmatprep.mubr.msk.bf16.mxu1 %vm3130_vm0, %v4239_v61 }
 0x5e6   :  { %1672 = vmatpush1.bf16.msra.mxu0 %v3742_v42  ;;  %2556 = vmatpush3.bf16.msra.mxu1 %v3745_v22 }
 0x5e7   :  { %1673 = vmatprep.subr.bf16.mxu0 %v3748_v56  ;;  %2557 = vmatprep.subr.bf16.mxu1 %v4239_v61 }
 0x5ea   :  { %1674 = vmatpush1.bf16.msra.mxu0 %v3752_v54  ;;  %2558 = vmatpush3.bf16.msra.mxu1 %v3755_v63 }
 0x5eb   :  { %1675 = vmatprep.subr.bf16.mxu0 %v3758_v52  ;;  %2559 = vmatprep.subr.bf16.mxu1 %v4239_v61 }
 0x5ee   :  { %1676 = vmatpush1.bf16.msra.mxu0 %v3762_v1  ;;  %2560 = vmatpush3.bf16.msra.mxu1 %v3765_v58 }
 0x5ef   :  { %1677 = vmatprep.subr.bf16.mxu0 %v3768_v0  ;;  %2561 = vmatprep.subr.bf16.mxu1 %v4239_v61 }
 0x5f2   :  { %1678 = vmatpush1.bf16.msra.mxu0 %v3772_v38  ;;  %2562 = vmatpush3.bf16.msra.mxu1 %v3775_v26 }
 0x5f3   :  { %1679 = vmatprep.subr.bf16.mxu0 %v3778_v55  ;;  %2563 = vmatprep.subr.bf16.mxu1 %v4239_v61 }
 0x5f6   :  { %1680 = vmatpush1.bf16.msra.mxu0 %v3782_v23  ;;  %2564 = vmatpush3.bf16.msra.mxu1 %v3877_v18 }
 0x5f7   :  { %1681 = vmatprep.subr.bf16.mxu0 %v3786_v62  ;;  %2565 = vmatprep.subr.bf16.mxu1 %v4239_v61 }
 0x5fa   :  { %1682 = vmatpush1.bf16.msra.mxu0 %v3790_v57  ;;  %2566 = vmatpush3.bf16.msra.mxu1 %v3883_v24 }
 0x5fb   :  { %1683 = vmatprep.subr.bf16.mxu0 %v3794_v37  ;;  %2567 = vmatprep.subr.bf16.mxu1 %v4239_v61 }
 0x5fe   :  { %1684 = vmatpush1.bf16.msra.mxu0 %v3798_v49  ;;  %2568 = vmatpush3.bf16.msra.mxu1 %v3889_v46 }
 0x5ff   :  { %1751 = vmatprep.subr.bf16.mxu0 %v3892_v28  ;;  %2573 = vmatprep.subr.bf16.mxu1 %v4239_v61 }
 0x601   :  { %1702 = vmatmul.mubr.bf16.vlgmr.msra.gmra.mrb[24].mxu0 %v1668_v29  ;;  %2570 = vmatmul.mubr.bf16.vlgmr.msra.gmra.mrb[48].mxu1 %v1668_v29 }
 0x602   :  { %1752 = vmatpush1.bf16.msra.mxu0 %v3898_v30  ;;  %2574 = vmatpush3.bf16.msra.mxu1 %v3901_v31 }
 0x603   :  { %1753 = vmatprep.subr.bf16.mxu0 %v3904_v32  ;;  %2575 = vmatprep.subr.bf16.mxu1 %v4239_v61 }
 0x604   :  { %1783 = vmatprep.mubr.bf16.mxu0 %v4240_v59  ;;  %2589 = vmatprep.mubr.msk.bf16.mxu1 %vm3130_vm0, %v4239_v61 }
 0x606   :  { %1754 = vmatpush1.bf16.msra.mxu0 %v3911_v34  ;;  %2576 = vmatpush3.bf16.msra.mxu1 %v3914_v35 }
 0x607   :  { %1755 = vmatprep.subr.bf16.mxu0 %v3917_v36  ;;  %2577 = vmatprep.subr.bf16.mxu1 %v4239_v61 }
 0x60a   :  { %1756 = vmatpush1.bf16.msra.mxu0 %v3921_v39  ;;  %2578 = vmatpush3.bf16.msra.mxu1 %v3924_v40 }
 0x60b   :  { %1757 = vmatprep.subr.bf16.mxu0 %v3927_v41  ;;  %2579 = vmatprep.subr.bf16.mxu1 %v4239_v61 }
 0x60e   :  { %1758 = vmatpush1.bf16.msra.mxu0 %v3931_v43  ;;  %2580 = vmatpush3.bf16.msra.mxu1 %v3934_v44 }
 0x60f   :  { %1759 = vmatprep.subr.bf16.mxu0 %v3937_v45  ;;  %2581 = vmatprep.subr.bf16.mxu1 %v4239_v61 }
 0x612   :  { %1760 = vmatpush1.bf16.msra.mxu0 %v3941_v48  ;;  %2582 = vmatpush3.bf16.msra.mxu1 %v3944_v51 }
 0x613   :  { %1761 = vmatprep.subr.bf16.mxu0 %v3947_v9  ;;  %2583 = vmatprep.subr.bf16.mxu1 %v4239_v61 }
 0x616   :  { %1762 = vmatpush1.bf16.msra.mxu0 %v4267_v6  ;;  %2584 = vmatpush3.bf16.msra.mxu1 %v4268_v4 }
 0x617   :  { %1763 = vmatprep.subr.bf16.mxu0 %v4269_v25  ;;  %2585 = vmatprep.subr.bf16.mxu1 %v4239_v61 }
 0x61a   :  { %1764 = vmatpush1.bf16.msra.mxu0 %v4270_v15  ;;  %2586 = vmatpush3.bf16.msra.mxu1 %v4271_v14 }
 0x61b   :  { %1765 = vmatprep.subr.bf16.mxu0 %v4272_v3  ;;  %2587 = vmatprep.subr.bf16.mxu1 %v4239_v61 }
 0x61e   :  { %1766 = vmatpush1.bf16.msra.mxu0 %v4273_v47  ;;  %2588 = vmatpush3.bf16.msra.mxu1 %v4274_v16 }
 0x61f   :  { %1867 = vmatprep.subr.bf16.mxu0 %v4275_v13  ;;  %2593 = vmatprep.subr.bf16.mxu1 %v4239_v61 }
 0x6b4   :  { %v1587_v5 = vpop.f32.mrb[20].mxu0  ;;  %v1628_v17 = vpop.f32.mrb[44].mxu1 }
 0x6b5   :  { %v2654_v50 = vadd.f32 %v3532_v53, %v1587_v5  ;;  %v1589_v10 = vpop.f32.mrb[21].mxu0  ;;  %v2551_v11 = vpop.f32.mrb[45].mxu1  ;;  %v1629_v6 = vadd.f32 %v1628_v17, %v3538_v33 }
 0x6b6   :  { %v1591_v7 = vpop.f32.mrb[22].mxu0  ;;  %v1631_v27 = vpop.f32.mrb[46].mxu1  ;;  %v2656_v15 = vadd.f32 %v3534_v2, %v1589_v10  ;;  %v1547_v11 = vadd.f32 %v4026_v8, %v3540_v60 }
 0x6b7   :  { %v2160_v29 = vmul.f32 -1.442695, %v2654_v50  ;;  %v1592_v3 = vpop.f32.mrb[23].mxu0  ;;  %v2552_v14 = vpop.f32.mrb[47].mxu1 }
 0x6b8   :  { %v2161_v47 = vmul.f32 -1.442695, %v2656_v15 }
 0x6b9   :  { %2829 = vpow2.f32 %v2160_v29 }
 0x6ba   :  { %2831 = vpow2.f32 %v2161_v47 }
 0x6c3   :  { %v2830_v16 = vpop.eup %2829 }
 0x6c4   :  { %v1638_v13 = vadd.f32 1.0, %v2830_v16  ;;  %v2832_v25 = vpop.eup %2831  ;;  %v1661_v16 = vpop.permute.xlu1 %1660 }
 0x6c5   :  { %v1645_v4 = vadd.f32 1.0, %v2832_v25  ;;  %vm1662_vm14 = vcmp.eq.s32.totalorder %v1661_v16, 1 }
 0x6c6   :  { %2833 = vrcp.f32 %v1638_v13 }
 0x6c7   :  { %2835 = vrcp.f32 %v1645_v4 }
 0x6d0   :  { %v2834_v5 = vpop.eup %2833 }
 0x6d1   :  { %v1648_v7 = vmul.f32 %v2834_v5, %v1629_v6  ;;  %v2836_v14 = vpop.eup %2835 }
 0x6d2   :  { %v1651_v50 = vsub.f32 1.0, %v2836_v14  ;;  %v1653_v47 = vmul.f32 %v2836_v14, %v3986_v12 }
 0x6d3   :  { %v1649_v3 = vadd.f32 %v1648_v7, %v1547_v11 }
 0x6d5   :  { %2837 = vtanh.f32 %v1649_v3 }
 0x6df   :  { %v2838_v10 = vpop.eup %2837 }
 0x6e0   :  { %v1652_v15 = vmul.f32 %v2838_v10, %v1651_v50 }
 0x6e2   :  { %v1654_v27 = vadd.f32 %v1653_v47, %v1652_v15 }
 0x6e4   :  { %v4070_v25 = vsel %vm1662_vm14, %v1654_v27, %v3986_v12 }
 0x6e5   :  { %1665 = vst [vmem:[#allocation14 + $0x28] sm:$0xff] %v4070_v25  ;;  %v1750_v8 = vpack.c.bf16 %v4070_v25, %v4070_v25 }
 0x6e7   :  { %1784 = vmatmul.mubr.bf16.vlgmr.msra.gmra.mrb[24].mxu0 %v1750_v8  ;;  %2590 = vmatmul.mubr.bf16.vlgmr.msra.gmra.mrb[52].mxu1 %v1750_v8 }
 0x6e8   :  { %1868 = vmatpush1.bf16.msra.mxu0 %v3729_v19  ;;  %2594 = vmatpush3.bf16.msra.mxu1 %v3732_v20  ;;  %v1744_v19 = vpop.f32.mrb[48].mxu1 }
 0x6e9   :  { %1869 = vmatprep.subr.bf16.mxu0 %v3735_v21  ;;  %2595 = vmatprep.subr.bf16.mxu1 %v4239_v61  ;;  %v2571_v20 = vpop.f32.mrb[49].mxu1 }
 0x6ea   :  { %1899 = vmatprep.mubr.bf16.mxu0 %v4240_v59  ;;  %2609 = vmatprep.mubr.msk.bf16.mxu1 %vm3130_vm0, %v4239_v61  ;;  %v1747_v21 = vpop.f32.mrb[50].mxu1 }
 0x6ec   :  { %1870 = vmatpush1.bf16.msra.mxu0 %v3742_v42  ;;  %2596 = vmatpush3.bf16.msra.mxu1 %v3745_v22  ;;  %v2572_v42 = vpop.f32.mrb[51].mxu1  ;;  %v1865_v22 = vld [vmem:[#allocation7 + $0x38] sm:$0xff] }
 0x6ed   :  { %1871 = vmatprep.subr.bf16.mxu0 %v3748_v56  ;;  %2597 = vmatprep.subr.bf16.mxu1 %v4239_v61  ;;  %v1866_v56 = vpack.c.bf16 %v1865_v22, %v1865_v22 }
 0x6f0   :  { %1872 = vmatpush1.bf16.msra.mxu0 %v3752_v54  ;;  %2598 = vmatpush3.bf16.msra.mxu1 %v3755_v63  ;;  %v4277_v54 = vld [vmem:[#allocation25_spill] sm:$0xff]  ;;  %v4278_v63 = vld [vmem:[#allocation30_spill] sm:$0xff] }
 0x6f1   :  { %1873 = vmatprep.subr.bf16.mxu0 %v3758_v52  ;;  %2599 = vmatprep.subr.bf16.mxu1 %v4239_v61  ;;  %v4279_v52 = vld [vmem:[#allocation26_spill] sm:$0xff] }
 0x6f4   :  { %1874 = vmatpush1.bf16.msra.mxu0 %v3762_v1  ;;  %2600 = vmatpush3.bf16.msra.mxu1 %v3765_v58  ;;  %v4280_v1 = vld [vmem:[#allocation27_spill] sm:$0xff] }
 0x6f5   :  { %1875 = vmatprep.subr.bf16.mxu0 %v3768_v0  ;;  %2601 = vmatprep.subr.bf16.mxu1 %v4239_v61  ;;  %v4281_v58 = vld [vmem:[#allocation31_spill] sm:$0xff]  ;;  %v4282_v0 = vld [vmem:[#allocation28_spill] sm:$0xff] }
 0x6f8   :  { %1876 = vmatpush1.bf16.msra.mxu0 %v3772_v38  ;;  %2602 = vmatpush3.bf16.msra.mxu1 %v3775_v26  ;;  %v4283_v38 = vld [vmem:[#allocation29_spill] sm:$0xff] }
 0x6f9   :  { %1877 = vmatprep.subr.bf16.mxu0 %v3778_v55  ;;  %2603 = vmatprep.subr.bf16.mxu1 %v4239_v61 }
 0x6fc   :  { %1878 = vmatpush1.bf16.msra.mxu0 %v3782_v23  ;;  %2604 = vmatpush3.bf16.msra.mxu1 %v3877_v18 }
 0x6fd   :  { %1879 = vmatprep.subr.bf16.mxu0 %v3786_v62  ;;  %2605 = vmatprep.subr.bf16.mxu1 %v4239_v61 }
 0x700   :  { %1880 = vmatpush1.bf16.msra.mxu0 %v3790_v57  ;;  %2606 = vmatpush3.bf16.msra.mxu1 %v3883_v24 }
 0x701   :  { %1881 = vmatprep.subr.bf16.mxu0 %v3794_v37  ;;  %2607 = vmatprep.subr.bf16.mxu1 %v4239_v61 }
 0x704   :  { %1882 = vmatpush1.bf16.msra.mxu0 %v3798_v49  ;;  %2608 = vmatpush3.bf16.msra.mxu1 %v3889_v46 }
 0x705   :  { %1949 = vmatprep.subr.bf16.mxu0 %v3892_v28  ;;  %2613 = vmatprep.subr.bf16.mxu1 %v4239_v61 }
 0x707   :  { %1900 = vmatmul.mubr.bf16.vlgmr.msra.gmra.mrb[28].mxu0 %v1866_v56  ;;  %2610 = vmatmul.mubr.bf16.vlgmr.msra.gmra.mrb[56].mxu1 %v1866_v56 }
 0x708   :  { %1950 = vmatpush1.bf16.msra.mxu0 %v3898_v30  ;;  %2614 = vmatpush3.bf16.msra.mxu1 %v3901_v31 }
 0x709   :  { %1951 = vmatprep.subr.bf16.mxu0 %v3904_v32  ;;  %2615 = vmatprep.subr.bf16.mxu1 %v4239_v61 }
 0x70a   :  { %1981 = vmatprep.mubr.bf16.mxu0 %v4240_v59  ;;  %2629 = vmatprep.mubr.msk.bf16.mxu1 %vm3130_vm0, %v4239_v61  ;;  %v4276_v59 = vld [vmem:[#allocation24_spill] sm:$0xff] }
 0x70c   :  { %1952 = vmatpush1.bf16.msra.mxu0 %v3911_v34  ;;  %2616 = vmatpush3.bf16.msra.mxu1 %v3914_v35 }
 0x70d   :  { %1953 = vmatprep.subr.bf16.mxu0 %v3917_v36  ;;  %2617 = vmatprep.subr.bf16.mxu1 %v4239_v61 }
 0x710   :  { %1954 = vmatpush1.bf16.msra.mxu0 %v3921_v39  ;;  %2618 = vmatpush3.bf16.msra.mxu1 %v3924_v40  ;;  %v1745_v39 = vadd.f32 %v1744_v19, %v3540_v60 }
 0x711   :  { %1955 = vmatprep.subr.bf16.mxu0 %v3927_v41  ;;  %2619 = vmatprep.subr.bf16.mxu1 %v4239_v61 }
 0x714   :  { %1956 = vmatpush1.bf16.msra.mxu0 %v3931_v43  ;;  %2620 = vmatpush3.bf16.msra.mxu1 %v3934_v44 }
 0x715   :  { %1957 = vmatprep.subr.bf16.mxu0 %v3937_v45  ;;  %2621 = vmatprep.subr.bf16.mxu1 %v4239_v61 }
 0x718   :  { %1958 = vmatpush1.bf16.msra.mxu0 %v3941_v48  ;;  %2622 = vmatpush3.bf16.msra.mxu1 %v3944_v51  ;;  %v1859_v48 = vpop.permute.xlu0 %1858 }
 0x719   :  { %1959 = vmatprep.subr.bf16.mxu0 %v3947_v9  ;;  %2623 = vmatprep.subr.bf16.mxu1 %v4239_v61  ;;  %vm1860_vm15 = vcmp.eq.s32.totalorder %v1859_v48, 1 }
 0x71c   :  { %1960 = vmatpush1.bf16.msra.mxu0 %v4276_v59  ;;  %2624 = vmatpush3.bf16.msra.mxu1 %v4277_v54 }
 0x71d   :  { %1961 = vmatprep.subr.bf16.mxu0 %v4278_v63  ;;  %2625 = vmatprep.subr.bf16.mxu1 %v4239_v61 }
 0x720   :  { %1962 = vmatpush1.bf16.msra.mxu0 %v4279_v52  ;;  %2626 = vmatpush3.bf16.msra.mxu1 %v4280_v1  ;;  %v2057_v1 = vpop.permute.xlu1 %2056 }
 0x721   :  { %1963 = vmatprep.subr.bf16.mxu0 %v4281_v58  ;;  %2627 = vmatprep.subr.bf16.mxu1 %v4239_v61  ;;  %vm2058_vm0 = vcmp.eq.s32.totalorder %v2057_v1, 1 }
 0x724   :  { %1964 = vmatpush1.bf16.msra.mxu0 %v4282_v0  ;;  %2628 = vmatpush3.bf16.msra.mxu1 %v4283_v38 }
 0x7ba   :  { %v1785_v26 = vpop.f32.mrb[24].mxu0  ;;  %v1826_v55 = vpop.f32.mrb[52].mxu1 }
 0x7bb   :  { %v2658_v23 = vadd.f32 %v3532_v53, %v1785_v26  ;;  %v1787_v62 = vpop.f32.mrb[25].mxu0  ;;  %v2591_v57 = vpop.f32.mrb[53].mxu1  ;;  %v1827_v35 = vadd.f32 %v1826_v55, %v3538_v33 }
 0x7bc   :  { %v1789_v37 = vpop.f32.mrb[26].mxu0  ;;  %v1829_v49 = vpop.f32.mrb[54].mxu1  ;;  %v2660_v28 = vadd.f32 %v3534_v2, %v1787_v62 }
 0x7bd   :  { %v2163_v18 = vmul.f32 -1.442695, %v2658_v23  ;;  %v1790_v24 = vpop.f32.mrb[27].mxu0  ;;  %v2592_v46 = vpop.f32.mrb[55].mxu1 }
 0x7be   :  { %v2164_v30 = vmul.f32 -1.442695, %v2660_v28 }
 0x7bf   :  { %2839 = vpow2.f32 %v2163_v18 }
 0x7c0   :  { %2841 = vpow2.f32 %v2164_v30 }
 0x7c9   :  { %v2840_v61 = vpop.eup %2839 }
 0x7ca   :  { %v1836_v31 = vadd.f32 1.0, %v2840_v61  ;;  %v2842_v32 = vpop.eup %2841 }
 0x7cb   :  { %v1843_v34 = vadd.f32 1.0, %v2842_v32 }
 0x7cc   :  { %2843 = vrcp.f32 %v1836_v31 }
 0x7cd   :  { %2845 = vrcp.f32 %v1843_v34 }
 0x7d6   :  { %v2844_v36 = vpop.eup %2843 }
 0x7d7   :  { %v1846_v40 = vmul.f32 %v2844_v36, %v1827_v35  ;;  %v2846_v43 = vpop.eup %2845 }
 0x7d8   :  { %v1849_v44 = vsub.f32 1.0, %v2846_v43  ;;  %v1851_v9 = vmul.f32 %v2846_v43, %v4070_v25 }
 0x7d9   :  { %v1847_v41 = vadd.f32 %v1846_v40, %v1745_v39 }
 0x7da   :  { %v1942_v17 = vpop.f32.mrb[56].mxu1 }
 0x7db   :  { %2847 = vtanh.f32 %v1847_v41  ;;  %v2611_v29 = vpop.f32.mrb[57].mxu1  ;;  %v1943_v56 = vadd.f32 %v1942_v17, %v3540_v60 }
 0x7dc   :  { %v1945_v13 = vpop.f32.mrb[58].mxu1 }
 0x7dd   :  { %v2612_v5 = vpop.f32.mrb[59].mxu1 }
 0x7e5   :  { %v2848_v45 = vpop.eup %2847 }
 0x7e6   :  { %v1850_v51 = vmul.f32 %v2848_v45, %v1849_v44 }
 0x7e8   :  { %v1852_v12 = vadd.f32 %v1851_v9, %v1850_v51 }
 0x7ea   :  { %v1861_v6 = vsel %vm1860_vm15, %v1852_v12, %v4070_v25 }
 0x7eb   :  { %1863 = vst [vmem:[#allocation14 + $0x30] sm:$0xff] %v1861_v6  ;;  %v1948_v4 = vpack.c.bf16 %v1861_v6, %v1861_v6 }
 0x7ed   :  { %1982 = vmatmul.mubr.bf16.vlgmr.msra.gmra.mrb[28].mxu0 %v1948_v4  ;;  %2630 = vmatmul.mubr.bf16.vlgmr.msra.gmra.mrb[60].mxu1 %v1948_v4 }
 0x8c0   :  { %v1983_v11 = vpop.f32.mrb[28].mxu0  ;;  %v2024_v7 = vpop.f32.mrb[60].mxu1 }
 0x8c1   :  { %v2662_v3 = vadd.f32 %v3532_v53, %v1983_v11  ;;  %v1985_v14 = vpop.f32.mrb[29].mxu0  ;;  %v2631_v50 = vpop.f32.mrb[61].mxu1  ;;  %v2025_v22 = vadd.f32 %v2024_v7, %v3538_v33 }
 0x8c2   :  { %v1987_v10 = vpop.f32.mrb[30].mxu0  ;;  %v2027_v15 = vpop.f32.mrb[62].mxu1  ;;  %v2664_v25 = vadd.f32 %v3534_v2, %v1985_v14 }
 0x8c3   :  { %v2166_v47 = vmul.f32 -1.442695, %v2662_v3  ;;  %v1988_v16 = vpop.f32.mrb[31].mxu0  ;;  %v2632_v27 = vpop.f32.mrb[63].mxu1 }
 0x8c4   :  { %v2167_v8 = vmul.f32 -1.442695, %v2664_v25 }
 0x8c5   :  { %2849 = vpow2.f32 %v2166_v47 }
 0x8c6   :  { %2851 = vpow2.f32 %v2167_v8 }
 0x8cf   :  { %v2850_v19 = vpop.eup %2849 }
 0x8d0   :  { %v2034_v20 = vadd.f32 1.0, %v2850_v19  ;;  %v2852_v21 = vpop.eup %2851 }
 0x8d1   :  { %v2041_v42 = vadd.f32 1.0, %v2852_v21 }
 0x8d2   :  { %2853 = vrcp.f32 %v2034_v20 }
 0x8d3   :  { %2855 = vrcp.f32 %v2041_v42 }
 0x8dc   :  { %v2854_v53 = vpop.eup %2853 }
 0x8dd   :  { %v2044_v59 = vmul.f32 %v2854_v53, %v2025_v22  ;;  %v2856_v63 = vpop.eup %2855 }
 0x8de   :  { %v2047_v52 = vsub.f32 1.0, %v2856_v63  ;;  %v2049_v0 = vmul.f32 %v2856_v63, %v1861_v6 }
 0x8df   :  { %v2045_v54 = vadd.f32 %v2044_v59, %v1943_v56 }
 0x8e1   :  { %2857 = vtanh.f32 %v2045_v54 }
 0x8eb   :  { %v2858_v2 = vpop.eup %2857 }
 0x8ec   :  { %v2048_v58 = vmul.f32 %v2858_v2, %v2047_v52 }
 0x8ee   :  { %v2050_v38 = vadd.f32 %v2049_v0, %v2048_v58 }
 0x8f0   :  { %v2059_v33 = vsel %vm2058_vm0, %v2050_v38, %v1861_v6 }
 0x8f1   :  { %2061 = vst [vmem:[#allocation14 + $0x38] sm:$0xff] %v2059_v33  ;;  %2062 = vst [vmem:[#allocation15] sm:$0xff] %v2059_v33 }
 0x8f2   :  { %3072 = shalt.err (!%p3069_p4)
}
 0x8f3   :  { %s3073_s28 = scalar_lea.hbm %s4187_s7, 1024 }
 0x8f4   :  { %p3074_p5 = scmp.ne.s32.totalorder %s4187_s7, %s3073_s28  ;;  %p3077_p6 = scmp.lt.u32.totalorder %s3073_s28, %s4187_s7 }
 0x8f6   :  { %p3079_p7 = pnand %p3077_p6, %p3074_p5 }
 0x8f8   :  { %3082 = shalt.err (!%p3079_p7)
}
 0x8f9   :  { %2074 = dma.vmem_to_hbm [thread:$0]  %s2069_s27, 1024, %s4187_s7, [#allocation4], %s3124_s0, %s3124_s0, %s3125_s12  }
 0x8fa   :  { %s3083_s13 = scalar_lea.vmem %s2082_s23, 128  ;;  %p3088_p9 = scmp.lt.s32.totalorder %s2082_s23, %s2082_s23 }
 0x8fb   :  { %p3084_p8 = scmp.ne.s32.totalorder %s2082_s23, %s3083_s13  ;;  %p3089_p10 = scmp.lt.s32.totalorder %s3083_s13, %s3083_s13 }
 0x8fd   :  { %p3090_p11 = por %p3089_p10, %p3088_p9 }
 0x8ff   :  { %p3091_p12 = pnand %p3090_p11, %p3084_p8 }
 0x901   :  { %3094 = shalt.err (!%p3091_p12)
}
 0x902   :  { %s3095_s16 = scalar_lea.hbm %s4188_s8, 128 }
 0x903   :  { %p3096_p13 = scmp.ne.s32.totalorder %s4188_s8, %s3095_s16  ;;  %p3099_p0 = scmp.lt.u32.totalorder %s3095_s16, %s4188_s8 }
 0x905   :  { %p3101_p1 = pnand %p3099_p0, %p3096_p13 }
 0x907   :  { %3104 = shalt.err (!%p3101_p1)
}
 0x908   :  { %2084 = dma.vmem_to_hbm [thread:$0]  %s2082_s23, 128, %s4188_s8, [#allocation16]  }
 0x909   :  { %3113 = dma.done.wait [#allocation4], 1024  }
 0x90a   :  { %3114 = vsyncadd [#allocation4], 4294966272 }
 0x90b   :  { %3115 = dma.done.wait [#allocation16], 128  }
 0x90c   :  { %3116 = vsyncadd [#allocation16], 4294967168 }
 0x90d   :  { %2091 = vsyncpa [#allocation3], 1 }
 0x90e   :  { %2092 = vsyncpa [#allocation6], 1 }
 0x90f   :  { %2093 = vsyncpa [#allocation9], 1 }
 0x910   :  { %2094 = vsyncpa [#allocation12], 1 }
 0x911   :  { %2095 = vsyncpa [#allocation4], 1 }
 0x912   :  { %2096 = vsyncpa [#allocation16], 1 }

</bundles_post_ra>
